<compile_context>
chip_gen: v6e
topology: v6e:2x2x1
jax: 0.10.0
libtpu: 0.0.40
codegen_flags: <defaults>
</compile_context>

<pallas_src>
import functools

import jax
import jax.numpy as jnp
from jax.experimental import pallas as pl
from jax.experimental.pallas import tpu as pltpu

_VMEM_LIMIT = 48 * 1024 * 1024  # below v7x's 64 MiB physical, above 32 MiB default


def _tile(dim, target, align):
    """Largest block <= target that divides `dim` and is a multiple of `align`.

    Falls back to the full dimension (always a legal Mosaic block)."""
    if dim <= target:
        return dim
    t = min(target, dim)
    t -= t % align
    while t >= align:
        if dim % t == 0:
            return t
        t -= align
    return dim


# ----------------------------- Pallas kernels -------------------------------

def _matmul_kernel(x_ref, w_ref, *rest, has_residual):
    """K-tiled matmul: acc zeroed at k==0, (residual+)write at k==last."""
    if has_residual:
        r_ref, o_ref, acc_ref = rest
    else:
        o_ref, acc_ref = rest
    k = pl.program_id(2)

    @pl.when(k == 0)
    def _():
        acc_ref[...] = jnp.zeros_like(acc_ref)

    acc_ref[...] += jnp.dot(x_ref[...], w_ref[...],
                            preferred_element_type=jnp.float32)

    @pl.when(k == pl.num_programs(2) - 1)
    def _():
        acc = acc_ref[...]
        if has_residual:
            acc = acc + r_ref[...].astype(jnp.float32)
        o_ref[...] = acc.astype(o_ref.dtype)


def _rms_linear_kernel(x_ref, g_ref, w_ref, o_ref, *, eps):
    """RMSNorm fused into the consumer matmul (x tile holds the full K=D)."""
    x = x_ref[...].astype(jnp.float32)
    var = jnp.mean(x * x, axis=-1, keepdims=True)
    xn = (x * jax.lax.rsqrt(var + eps)
          * g_ref[...].astype(jnp.float32)).astype(w_ref.dtype)
    o_ref[...] = jnp.dot(xn, w_ref[...],
                         preferred_element_type=jnp.float32).astype(o_ref.dtype)


def _rmsnorm_kernel(x_ref, g_ref, o_ref, *, eps, add_residual):
    x = x_ref[...].astype(jnp.float32)
    var = jnp.mean(x * x, axis=-1, keepdims=True)
    y = x * jax.lax.rsqrt(var + eps) * g_ref[...].astype(jnp.float32)
    if add_residual:
        y = y + x
    o_ref[...] = y.astype(o_ref.dtype)


def _rot_half(x):
    h = x.shape[-1] // 2
    return jnp.concatenate([-x[:, h:], x[:, :h]], axis=-1)


def _flash_attn_kernel(q_ref, kv_ref, mask_ref, *rest, scale, use_rotary):
    """Flash attention over (B, H, Tq-tile, Tk-tile) grid; Tk axis is the
    reduction ('arbitrary'); rotary embedding fused on q/k tiles."""
    if use_rotary:
        cq_ref, sq_ref, ck_ref, sk_ref, o_ref, m_sc, l_sc, acc_sc = rest
    else:
        o_ref, m_sc, l_sc, acc_sc = rest

    ki = pl.program_id(3)

    @pl.when(ki == 0)
    def _():
        m_sc[...] = jnp.full_like(m_sc, -jnp.inf)
        l_sc[...] = jnp.zeros_like(l_sc)
        acc_sc[...] = jnp.zeros_like(acc_sc)

    dt = kv_ref.dtype
    q = q_ref[0, 0].astype(jnp.float32)          # [Tq, hd]
    k = kv_ref[0, 0, 0].astype(jnp.float32)      # [Tk, hd]
    v = kv_ref[1, 0, 0]                          # [Tk, hd] (bf16)

    if use_rotary:
        q = q * cq_ref[...] + _rot_half(q) * sq_ref[...]
        k = k * ck_ref[...] + _rot_half(k) * sk_ref[...]
    q = q * scale                                # fold scale into q once

    # q . k^T with contraction on the last axes (no materialized k.T).
    s = jax.lax.dot_general(
        q.astype(dt), k.astype(dt),
        dimension_numbers=(((1,), (1,)), ((), ())),
        preferred_element_type=jnp.float32)      # [Tq, Tk]
    s = s + mask_ref[0, 0]

    m_prev = m_sc[...]
    m_new = jnp.maximum(m_prev, jnp.max(s, axis=-1, keepdims=True))
    alpha = jnp.exp(m_prev - m_new)
    p = jnp.exp(s - m_new)
    l_sc[...] = alpha * l_sc[...] + jnp.sum(p, axis=-1, keepdims=True)
    acc_sc[...] = alpha * acc_sc[...] + jax.lax.dot_general(
        p.astype(v.dtype), v,
        dimension_numbers=(((1,), (0,)), ((), ())),
        preferred_element_type=jnp.float32)
    m_sc[...] = m_new

    @pl.when(ki == pl.num_programs(3) - 1)
    def _():
        inv = pl.reciprocal(l_sc[...], approx=True)
        o_ref[0, 0] = (acc_sc[...] * inv).astype(o_ref.dtype)


def _geglu_kernel(x_ref, g_ref, wg_ref, wu_ref, wd_ref, o_ref,
                  xn_ref, acc_ref, *, eps):
    """Fused: xn = RMSNorm(x) (once, at f==0); per F-tile gate/up/gelu/mul and
    accumulated down-projection; residual add at the last F step."""
    f = pl.program_id(1)

    @pl.when(f == 0)
    def _():
        x = x_ref[...].astype(jnp.float32)
        var = jnp.mean(x * x, axis=-1, keepdims=True)
        xn_ref[...] = (x * jax.lax.rsqrt(var + eps)
                       * g_ref[...].astype(jnp.float32)).astype(xn_ref.dtype)
        acc_ref[...] = jnp.zeros_like(acc_ref)

    xn = xn_ref[...]
    gate = jnp.dot(xn, wg_ref[...], preferred_element_type=jnp.float32)
    up = jnp.dot(xn, wu_ref[...], preferred_element_type=jnp.float32)
    h = jax.nn.gelu(gate, approximate=True) * up
    acc_ref[...] += jnp.dot(h.astype(wd_ref.dtype), wd_ref[...],
                            preferred_element_type=jnp.float32)

    @pl.when(f == pl.num_programs(1) - 1)
    def _():
        o_ref[...] = (x_ref[...].astype(jnp.float32) + acc_ref[...]).astype(o_ref.dtype)


def _gated_highway_kernel(x_ref, wg_ref, bg_ref, ww_ref, o_ref):
    x = x_ref[...]
    g = jnp.dot(x, wg_ref[...], preferred_element_type=jnp.float32) \
        + bg_ref[...].astype(jnp.float32)
    h = jnp.dot(x, ww_ref[...], preferred_element_type=jnp.float32)
    o_ref[...] = (jax.nn.sigmoid(g) * h).astype(o_ref.dtype)


# ----------------------------- kernel wrappers -------------------------------

def linear(x2d, w, residual=None, out_dtype=None, tm=256, tn=512, tk=512):
    """x2d: [M, K]; w: [K, N]; optional residual [M, N] fused at the last K step."""
    M, K = x2d.shape
    N = w.shape[1]
    bm = _tile(M, tm, 8)
    bn = _tile(N, tn, 128)
    bk = _tile(K, tk, 128)
    in_specs = [pl.BlockSpec((bm, bk), lambda i, j, k: (i, k)),
                pl.BlockSpec((bk, bn), lambda i, j, k: (k, j))]
    args = [x2d, w]
    if residual is not None:
        in_specs.append(pl.BlockSpec((bm, bn), lambda i, j, k: (i, j)))
        args.append(residual)
    return pl.pallas_call(
        functools.partial(_matmul_kernel, has_residual=residual is not None),
        out_shape=jax.ShapeDtypeStruct((M, N), out_dtype or x2d.dtype),
        grid=(M // bm, N // bn, K // bk),
        in_specs=in_specs,
        out_specs=pl.BlockSpec((bm, bn), lambda i, j, k: (i, j)),
        scratch_shapes=[pltpu.VMEM((bm, bn), jnp.float32)],
        compiler_params=pltpu.CompilerParams(
            dimension_semantics=("parallel", "parallel", "arbitrary"),
            vmem_limit_bytes=_VMEM_LIMIT),
    )(*args)


def rms_linear(x2d, gamma, w, *, eps, out_dtype=None, tm=256, tn=512):
    """Fused RMSNorm(x) @ w. x2d: [M, K]; gamma: [K]; w: [K, N]."""
    M, K = x2d.shape
    N = w.shape[1]
    bm = _tile(M, tm, 8)
    bn = _tile(N, tn, 128)
    return pl.pallas_call(
        functools.partial(_rms_linear_kernel, eps=eps),
        out_shape=jax.ShapeDtypeStruct((M, N), out_dtype or x2d.dtype),
        grid=(M // bm, N // bn),
        in_specs=[pl.BlockSpec((bm, K), lambda i, j: (i, 0)),
                  pl.BlockSpec((1, K), lambda i, j: (0, 0)),
                  pl.BlockSpec((K, bn), lambda i, j: (0, j))],
        out_specs=pl.BlockSpec((bm, bn), lambda i, j: (i, j)),
        compiler_params=pltpu.CompilerParams(
            dimension_semantics=("parallel", "parallel"),
            vmem_limit_bytes=_VMEM_LIMIT),
    )(x2d, gamma.reshape(1, K), w)


def rmsnorm(x, gamma, *, eps, add_residual=False, tm=256):
    """x: [B, T, D]; gamma: [D]. Optionally returns x + rms(x)*gamma (fused residual)."""
    B, T, D = x.shape
    M = B * T
    bm = _tile(M, tm, 8)
    out = pl.pallas_call(
        functools.partial(_rmsnorm_kernel, eps=eps, add_residual=add_residual),
        out_shape=jax.ShapeDtypeStruct((M, D), x.dtype),
        grid=(M // bm,),
        in_specs=[pl.BlockSpec((bm, D), lambda i: (i, 0)),
                  pl.BlockSpec((1, D), lambda i: (0, 0))],
        out_specs=pl.BlockSpec((bm, D), lambda i: (i, 0)),
        compiler_params=pltpu.CompilerParams(
            dimension_semantics=("parallel",),
            vmem_limit_bytes=_VMEM_LIMIT),
    )(x.reshape(M, D), gamma.reshape(1, D))
    return out.reshape(B, T, D)


def flash_attention(qh, kvh, mask, cos, sin, *, scale, use_rotary,
                    tq=256, tk=256):
    """qh: [B,H,T,hd]; kvh: [2,B,H,T,hd] (k stacked with v); mask: [B,1,T,T]."""
    B, H, T, hd = qh.shape
    Tq = _tile(T, tq, 8)
    Tk = _tile(T, tk, 128)   # last dim of the mask block -> 128-aligned or full
    in_specs = [
        pl.BlockSpec((1, 1, Tq, hd), lambda b, h, qi, ki: (b, h, qi, 0)),
        pl.BlockSpec((2, 1, 1, Tk, hd), lambda b, h, qi, ki: (0, b, h, ki, 0)),
        pl.BlockSpec((1, 1, Tq, Tk), lambda b, h, qi, ki: (b, 0, qi, ki)),
    ]
    args = [qh, kvh, mask]
    if use_rotary:
        in_specs += [
            pl.BlockSpec((Tq, hd), lambda b, h, qi, ki: (qi, 0)),
            pl.BlockSpec((Tq, hd), lambda b, h, qi, ki: (qi, 0)),
            pl.BlockSpec((Tk, hd), lambda b, h, qi, ki: (ki, 0)),
            pl.BlockSpec((Tk, hd), lambda b, h, qi, ki: (ki, 0)),
        ]
        args += [cos, sin, cos, sin]
    return pl.pallas_call(
        functools.partial(_flash_attn_kernel, scale=scale, use_rotary=use_rotary),
        out_shape=jax.ShapeDtypeStruct((B, H, T, hd), qh.dtype),
        grid=(B, H, T // Tq, T // Tk),
        in_specs=in_specs,
        out_specs=pl.BlockSpec((1, 1, Tq, hd), lambda b, h, qi, ki: (b, h, qi, 0)),
        scratch_shapes=[pltpu.VMEM((Tq, 1), jnp.float32),
                        pltpu.VMEM((Tq, 1), jnp.float32),
                        pltpu.VMEM((Tq, hd), jnp.float32)],
        compiler_params=pltpu.CompilerParams(
            dimension_semantics=("parallel", "parallel", "parallel", "arbitrary"),
            vmem_limit_bytes=_VMEM_LIMIT),
    )(*args)


def geglu_mlp(x, gamma, wg, wu, wd, *, eps, tm=256, tf=512):
    """Returns x + down( gelu(gate(rms(x))) * up(rms(x)) ). x: [B, T, D]."""
    B, T, D = x.shape
    M = B * T
    F = wg.shape[1]
    bm = _tile(M, tm, 8)
    bf = _tile(F, tf, 128)
    out = pl.pallas_call(
        functools.partial(_geglu_kernel, eps=eps),
        out_shape=jax.ShapeDtypeStruct((M, D), x.dtype),
        grid=(M // bm, F // bf),
        in_specs=[pl.BlockSpec((bm, D), lambda i, f: (i, 0)),
                  pl.BlockSpec((1, D), lambda i, f: (0, 0)),
                  pl.BlockSpec((D, bf), lambda i, f: (0, f)),
                  pl.BlockSpec((D, bf), lambda i, f: (0, f)),
                  pl.BlockSpec((bf, D), lambda i, f: (f, 0))],
        out_specs=pl.BlockSpec((bm, D), lambda i, f: (i, 0)),
        scratch_shapes=[pltpu.VMEM((bm, D), x.dtype),
                        pltpu.VMEM((bm, D), jnp.float32)],
        compiler_params=pltpu.CompilerParams(
            dimension_semantics=("parallel", "arbitrary"),
            vmem_limit_bytes=_VMEM_LIMIT),
    )(x.reshape(M, D), gamma.reshape(1, D), wg, wu, wd)
    return out.reshape(B, T, D)


def gated_highway(x, p, *, tm=256, tn=512):
    """x: [B, T, D]; p = dict(wg [D,D], bg [D], ww [D,D])."""
    B, T, D = x.shape
    M = B * T
    N = p["ww"].shape[1]
    bm = _tile(M, tm, 8)
    bn = _tile(N, tn, 128)
    out = pl.pallas_call(
        _gated_highway_kernel,
        out_shape=jax.ShapeDtypeStruct((M, N), x.dtype),
        grid=(M // bm, N // bn),
        in_specs=[pl.BlockSpec((bm, D), lambda i, j: (i, 0)),
                  pl.BlockSpec((D, bn), lambda i, j: (0, j)),
                  pl.BlockSpec((1, bn), lambda i, j: (0, j)),
                  pl.BlockSpec((D, bn), lambda i, j: (0, j))],
        out_specs=pl.BlockSpec((bm, bn), lambda i, j: (i, j)),
        compiler_params=pltpu.CompilerParams(
            dimension_semantics=("parallel", "parallel"),
            vmem_limit_bytes=_VMEM_LIMIT),
    )(x.reshape(M, D), p["wg"], p["bg"].reshape(1, N), p["ww"])
    return out.reshape(B, T, N)


# ----------------------------- model pieces ---------------------------------

def _rotary_tables(T, hd, base=10000.0):
    inv = 1.0 / (base ** (jnp.arange(0, hd, 2, dtype=jnp.float32) / hd))
    freqs = jnp.outer(jnp.arange(T, dtype=jnp.float32), inv)   # [T, hd//2]
    emb = jnp.concatenate([freqs, freqs], axis=-1)             # [T, hd]
    return jnp.cos(emb), jnp.sin(emb)


def _split_heads(y2d, B, T, H, hd):
    # TODO(synk): the head-split transpose still goes through an XLA relayout;
    # at 128-aligned head_dim it could be folded into the projection out_spec.
    return y2d.reshape(B, T, H, hd).transpose(0, 2, 1, 3)          # [B,H,T,hd]


def _split_kv_heads(kv2d, B, T, H, hd):
    return kv2d.reshape(B, T, 2, H, hd).transpose(2, 0, 3, 1, 4)   # [2,B,H,T,hd]


def _attn_block(q2d, kv2d, wo, residual2d, mask, cfg, cos, sin, use_rotary):
    B, T = cfg["_bt"]
    H, hd = cfg["heads"], cfg["head_dim"]
    qh = _split_heads(q2d, B, T, H, hd)
    kvh = _split_kv_heads(kv2d, B, T, H, hd)
    attn = flash_attention(qh, kvh, mask, cos, sin,
                           scale=hd ** -0.5, use_rotary=use_rotary)
    attn2 = attn.transpose(0, 2, 1, 3).reshape(B * T, H * hd)
    # o_proj with the residual add fused into the matmul epilogue.
    return linear(attn2, wo, residual=residual2d)


def decoder_layer(x, lp, mask, cfg, cos, sin):
    """Gemma decoder layer: RMSNorm -> self-attn -> res -> RMSNorm -> GeGLU -> res."""
    B, T, D = x.shape
    eps = cfg["eps"]
    x2 = x.reshape(B * T, D)
    # RMSNorm fused into the projections; k/v share one fused [D, 2*H*hd] matmul.
    q = rms_linear(x2, lp["ln1"], lp["wq"], eps=eps)
    kv = rms_linear(x2, lp["ln1"], lp["wkv"], eps=eps)
    x2 = _attn_block(q, kv, lp["wo"], x2, mask, cfg, cos, sin, use_rotary=True)
    x = x2.reshape(B, T, D)
    return geglu_mlp(x, lp["ln2"], lp["w_gate"], lp["w_up"], lp["w_down"], eps=eps)


def module_block(x_mod, x_back, mask, lp, mp, cfg, cos, sin):
    """ModuleBlock: feedback/driver highways + cross-attn + inner block (self_attn=Identity)."""
    B, T, D = x_mod.shape
    eps = cfg["eps"]
    xm2 = x_mod.reshape(B * T, D)
    xb2 = x_back.reshape(B * T, D)
    delta = gated_highway(x_mod, mp["feedback"])
    # CrossAttentionFromSelf shares q/k/v/o weights with the backbone layer;
    # the per-layer attention has no rotary_emb attribute -> rotary is None.
    q = rms_linear(xm2, mp["cross_ln"], lp["wq"], eps=1e-5)   # nn.RMSNorm(eps=1e-5)
    kv = linear(xb2, lp["wkv"])
    mod_plus_x = _attn_block(q, kv, lp["wo"], xm2, mask, cfg, cos, sin,
                             use_rotary=False)                # x_mod + cross_attn
    drv = gated_highway(x_back, mp["driver"])
    x = mod_plus_x.reshape(B, T, D) + drv
    # Inner block with self_attn replaced by nn.Identity():
    # TODO(synk): torch Identity would reject kwargs; we implement the intended
    # pass-through semantics: attn-output == input_layernorm(x), then residual.
    x = rmsnorm(x, lp["ln1"], eps=eps, add_residual=True)
    x = geglu_mlp(x, lp["ln2"], lp["w_gate"], lp["w_up"], lp["w_down"], eps=eps)
    return x, delta


def gemma_modular_forward(params, ids, mask, cfg):
    B, T = ids.shape
    D, V = cfg["hidden"], cfg["vocab"]
    cfg = dict(cfg, _bt=(B, T))
    cos, sin = _rotary_tables(T, cfg["head_dim"])
    # Reference GemmaModular calls embed_tokens directly (bypasses GemmaModel's
    # sqrt(hidden) normalizer), so no embedding scaling here.
    h_back = jnp.take(params["embed"], ids, axis=0)            # [B, T, D] bf16
    split, nlayers = cfg["split"], cfg["layers"]
    for i in range(split):
        h_back = decoder_layer(h_back, params["layers"][i], mask, cfg, cos, sin)
    h_mod = h_back
    feedback = jnp.zeros_like(h_back)
    for j, i in enumerate(range(split, nlayers)):
        h_back_in = h_back + feedback
        h_back = decoder_layer(h_back_in, params["layers"][i], mask, cfg, cos, sin)
        h_mod, feedback = module_block(h_mod, h_back, mask,
                                       params["layers"][i], params["mod"][j],
                                       cfg, cos, sin)
    # Final RMSNorm fused into the lm_head matmul; logits kept in f32.
    logits = rms_linear(h_mod.reshape(B * T, D), params["ln_f"], params["lm_head"],
                        eps=cfg["eps"], out_dtype=jnp.float32)
    return logits.reshape(B, T, V)


# ----------------------------- parameter init --------------------------------

def init_params(key, cfg):
    D, F, V = cfg["hidden"], cfg["ffn"], cfg["vocab"]
    A = cfg["heads"] * cfg["head_dim"]
    keys = iter(jax.random.split(key, 64))

    def w(shape, scale=0.02):
        return (scale * jax.random.normal(next(keys), shape)).astype(jnp.bfloat16)

    def ones(n):
        # Norm weight applied multiplicatively; equals torch RMSNorm default init.
        # (For real Gemma checkpoints one would pass (1 + weight) here.)
        return jnp.ones((n,), jnp.bfloat16)

    layers = []
    for _ in range(cfg["layers"]):
        layers.append(dict(
            ln1=ones(D), ln2=ones(D),
            wq=w((D, A)),
            wkv=w((D, 2 * A)),        # fused [Wk | Wv] along the output axis
            wo=w((A, D)),
            w_gate=w((D, F)), w_up=w((D, F)), w_down=w((F, D)),
        ))

    def zero_highway():  # GatedHighway is initialised closed: all zeros.
        return dict(wg=jnp.zeros((D, D), jnp.bfloat16),
                    bg=jnp.zeros((D,), jnp.bfloat16),
                    ww=jnp.zeros((D, D), jnp.bfloat16))

    mods = [dict(cross_ln=ones(D), driver=zero_highway(), feedback=zero_highway())
            for _ in range(cfg["layers"] - cfg["split"])]

    return dict(embed=w((V, D)), layers=layers, mod=mods,
                ln_f=ones(D), lm_head=w((D, V)))


# ---------------------------------- main -------------------------------------

if __name__ == "__main__":
    cfg = dict(vocab=256, hidden=32, heads=4, head_dim=8, ffn=64, layers=3,
               eps=1e-6)
    cfg["split"] = cfg["layers"] * 2 // 3          # = 2 -> one ModuleBlock

    B, T = 2, 8
    key = jax.random.PRNGKey(0)
    kp, ki = jax.random.split(key)
    params = init_params(kp, cfg)
    ids = jax.random.randint(ki, (B, T), 0, cfg["vocab"], dtype=jnp.int32)

    # Causal additive mask, broadcast to [B, 1, T, T] (HF-style).
    causal = jnp.tril(jnp.ones((T, T), jnp.bool_))
    mask = jnp.where(causal, 0.0, -1e9).astype(jnp.float32)
    mask = jnp.broadcast_to(mask[None, None], (B, 1, T, T))

    fwd = jax.jit(functools.partial(gemma_modular_forward, cfg=cfg))
    logits = fwd(params, ids, mask)
    jax.block_until_ready(logits)
    assert logits.shape == (B, T, cfg["vocab"]) and logits.dtype == jnp.float32
    assert bool(jnp.all(jnp.isfinite(logits)))
    print("KERNEL_OK")
</pallas_src>

<mosaic_0001>
module attributes {stable_mosaic.version = 11 : i64} {
  func.func @_rms_linear_kernel(%arg0: i32, %arg1: i32, %arg2: memref<16x32xbf16, #tpu.memory_space<vmem>>, %arg3: memref<1x32xbf16, #tpu.memory_space<vmem>>, %arg4: memref<32x64xbf16, #tpu.memory_space<vmem>>, %arg5: memref<16x64xbf16, #tpu.memory_space<vmem>>) attributes {dimension_semantics = [#tpu.dimension_semantics<parallel>, #tpu.dimension_semantics<parallel>], iteration_bounds = array<i64: 1, 1>, scalar_prefetch = 0 : i64, scratch_operands = 0 : i64, tpu.core_type = #tpu.core_type<tc>, window_params = [{transform_indices = @transform_0, window_bounds = array<i64: 16, 32>}, {pipeline_mode = #tpu.pipeline_mode<synchronous>, transform_indices = @transform_1, window_bounds = array<i64: 1, 32>}, {transform_indices = @transform_2, window_bounds = array<i64: 32, 64>}, {transform_indices = @transform_3, window_bounds = array<i64: 16, 64>}]} {
    %c0 = arith.constant 0 : index
    %c0_0 = arith.constant 0 : index
    %0 = vector.load %arg2[%c0, %c0_0] : memref<16x32xbf16, #tpu.memory_space<vmem>>, vector<16x32xbf16>
    %1 = arith.extf %0 : vector<16x32xbf16> to vector<16x32xf32>
    %2 = arith.mulf %1, %1 : vector<16x32xf32>
    %cst = arith.constant dense<0.000000e+00> : vector<16xf32>
    %3 = vector.multi_reduction <add>, %2, %cst [1] : vector<16x32xf32> to vector<16xf32>
    %4 = vector.shape_cast %3 : vector<16xf32> to vector<16x1xf32>
    %cst_1 = arith.constant 3.200000e+01 : f32
    %5 = vector.broadcast %cst_1 : f32 to vector<16x1xf32>
    %6 = arith.divf %4, %5 : vector<16x1xf32>
    %cst_2 = arith.constant 9.99999997E-7 : f32
    %7 = vector.broadcast %cst_2 : f32 to vector<16x1xf32>
    %8 = arith.addf %6, %7 : vector<16x1xf32>
    %9 = math.rsqrt %8 : vector<16x1xf32>
    %10 = vector.broadcast %9 : vector<16x1xf32> to vector<16x32xf32>
    %11 = arith.mulf %1, %10 : vector<16x32xf32>
    %c0_3 = arith.constant 0 : index
    %c0_4 = arith.constant 0 : index
    %12 = vector.load %arg3[%c0_3, %c0_4] : memref<1x32xbf16, #tpu.memory_space<vmem>>, vector<1x32xbf16>
    %13 = arith.extf %12 : vector<1x32xbf16> to vector<1x32xf32>
    %14 = vector.broadcast %13 : vector<1x32xf32> to vector<16x32xf32>
    %15 = arith.mulf %11, %14 : vector<16x32xf32>
    %16 = arith.truncf %15 : vector<16x32xf32> to vector<16x32xbf16>
    %c0_5 = arith.constant 0 : index
    %c0_6 = arith.constant 0 : index
    %17 = vector.load %arg4[%c0_5, %c0_6] : memref<32x64xbf16, #tpu.memory_space<vmem>>, vector<32x64xbf16>
    %cst_7 = arith.constant dense<0.000000e+00> : vector<16x64xf32>
    %18 = tpu.matmul %16, %17, %cst_7 {dimension_numbers = #tpu.dot_dimension_numbers<[1], [0], [0], [1], [0, 0, 1, 1], [], []>} : vector<16x32xbf16>, vector<32x64xbf16>, vector<16x64xf32> -> vector<16x64xf32>
    %19 = arith.truncf %18 : vector<16x64xf32> to vector<16x64xbf16>
    %c0_8 = arith.constant 0 : index
    %c0_9 = arith.constant 0 : index
    %20 = vector.load %arg5[%c0_8, %c0_9] : memref<16x64xbf16, #tpu.memory_space<vmem>>, vector<16x64xbf16>
    tpu.vector_store %arg5[%c0_8, %c0_9], %19 {strides = array<i32>} : memref<16x64xbf16, #tpu.memory_space<vmem>>, vector<16x64xbf16>,
    return
  }
  func.func @transform_0(%arg0: i32, %arg1: i32) -> (i32, i32) {
    %c0_i32 = arith.constant 0 : i32
    %c0_i32_0 = arith.constant 0 : i32
    return %arg0, %c0_i32 : i32, i32
  }
  func.func @transform_1(%arg0: i32, %arg1: i32) -> (i32, i32) {
    %c0_i32 = arith.constant 0 : i32
    %c0_i32_0 = arith.constant 0 : i32
    %c0_i32_1 = arith.constant 0 : i32
    return %c0_i32, %c0_i32_0 : i32, i32
  }
  func.func @transform_2(%arg0: i32, %arg1: i32) -> (i32, i32) {
    %c0_i32 = arith.constant 0 : i32
    %c0_i32_0 = arith.constant 0 : i32
    return %c0_i32, %arg1 : i32, i32
  }
  func.func @transform_3(%arg0: i32, %arg1: i32) -> (i32, i32) {
    %c0_i32 = arith.constant 0 : i32
    return %arg0, %arg1 : i32, i32
  }
}

module attributes {stable_mosaic.version = 11 : i64} {
  func.func @_rms_linear_kernel(%arg0: i32, %arg1: i32, %arg2: memref<16x32xbf16, #tpu.memory_space<vmem>>, %arg3: memref<1x32xbf16, #tpu.memory_space<vmem>>, %arg4: memref<32x32xbf16, #tpu.memory_space<vmem>>, %arg5: memref<16x32xbf16, #tpu.memory_space<vmem>>) attributes {dimension_semantics = [#tpu.dimension_semantics<parallel>, #tpu.dimension_semantics<parallel>], iteration_bounds = array<i64: 1, 1>, scalar_prefetch = 0 : i64, scratch_operands = 0 : i64, tpu.core_type = #tpu.core_type<tc>, window_params = [{transform_indices = @transform_0, window_bounds = array<i64: 16, 32>}, {pipeline_mode = #tpu.pipeline_mode<synchronous>, transform_indices = @transform_1, window_bounds = array<i64: 1, 32>}, {transform_indices = @transform_2, window_bounds = array<i64: 32, 32>}, {transform_indices = @transform_3, window_bounds = array<i64: 16, 32>}]} {
    %c0 = arith.constant 0 : index
    %c0_0 = arith.constant 0 : index
    %0 = vector.load %arg2[%c0, %c0_0] : memref<16x32xbf16, #tpu.memory_space<vmem>>, vector<16x32xbf16>
    %1 = arith.extf %0 : vector<16x32xbf16> to vector<16x32xf32>
    %2 = arith.mulf %1, %1 : vector<16x32xf32>
    %cst = arith.constant dense<0.000000e+00> : vector<16xf32>
    %3 = vector.multi_reduction <add>, %2, %cst [1] : vector<16x32xf32> to vector<16xf32>
    %4 = vector.shape_cast %3 : vector<16xf32> to vector<16x1xf32>
    %cst_1 = arith.constant 3.200000e+01 : f32
    %5 = vector.broadcast %cst_1 : f32 to vector<16x1xf32>
    %6 = arith.divf %4, %5 : vector<16x1xf32>
    %cst_2 = arith.constant 9.99999997E-7 : f32
    %7 = vector.broadcast %cst_2 : f32 to vector<16x1xf32>
    %8 = arith.addf %6, %7 : vector<16x1xf32>
    %9 = math.rsqrt %8 : vector<16x1xf32>
    %10 = vector.broadcast %9 : vector<16x1xf32> to vector<16x32xf32>
    %11 = arith.mulf %1, %10 : vector<16x32xf32>
    %c0_3 = arith.constant 0 : index
    %c0_4 = arith.constant 0 : index
    %12 = vector.load %arg3[%c0_3, %c0_4] : memref<1x32xbf16, #tpu.memory_space<vmem>>, vector<1x32xbf16>
    %13 = arith.extf %12 : vector<1x32xbf16> to vector<1x32xf32>
    %14 = vector.broadcast %13 : vector<1x32xf32> to vector<16x32xf32>
    %15 = arith.mulf %11, %14 : vector<16x32xf32>
    %16 = arith.truncf %15 : vector<16x32xf32> to vector<16x32xbf16>
    %c0_5 = arith.constant 0 : index
    %c0_6 = arith.constant 0 : index
    %17 = vector.load %arg4[%c0_5, %c0_6] : memref<32x32xbf16, #tpu.memory_space<vmem>>, vector<32x32xbf16>
    %cst_7 = arith.constant dense<0.000000e+00> : vector<16x32xf32>
    %18 = tpu.matmul %16, %17, %cst_7 {dimension_numbers = #tpu.dot_dimension_numbers<[1], [0], [0], [1], [0, 0, 1, 1], [], []>} : vector<16x32xbf16>, vector<32x32xbf16>, vector<16x32xf32> -> vector<16x32xf32>
    %19 = arith.truncf %18 : vector<16x32xf32> to vector<16x32xbf16>
    %c0_8 = arith.constant 0 : index
    %c0_9 = arith.constant 0 : index
    %20 = vector.load %arg5[%c0_8, %c0_9] : memref<16x32xbf16, #tpu.memory_space<vmem>>, vector<16x32xbf16>
    tpu.vector_store %arg5[%c0_8, %c0_9], %19 {strides = array<i32>} : memref<16x32xbf16, #tpu.memory_space<vmem>>, vector<16x32xbf16>,
    return
  }
  func.func @transform_0(%arg0: i32, %arg1: i32) -> (i32, i32) {
    %c0_i32 = arith.constant 0 : i32
    %c0_i32_0 = arith.constant 0 : i32
    return %arg0, %c0_i32 : i32, i32
  }
  func.func @transform_1(%arg0: i32, %arg1: i32) -> (i32, i32) {
    %c0_i32 = arith.constant 0 : i32
    %c0_i32_0 = arith.constant 0 : i32
    %c0_i32_1 = arith.constant 0 : i32
    return %c0_i32, %c0_i32_0 : i32, i32
  }
  func.func @transform_2(%arg0: i32, %arg1: i32) -> (i32, i32) {
    %c0_i32 = arith.constant 0 : i32
    %c0_i32_0 = arith.constant 0 : i32
    return %c0_i32, %arg1 : i32, i32
  }
  func.func @transform_3(%arg0: i32, %arg1: i32) -> (i32, i32) {
    %c0_i32 = arith.constant 0 : i32
    return %arg0, %arg1 : i32, i32
  }
}

module attributes {stable_mosaic.version = 11 : i64} {
  func.func @_flash_attn_kernel(%arg0: i32, %arg1: i32, %arg2: i32, %arg3: i32, %arg4: memref<1x1x8x8xbf16, #tpu.memory_space<vmem>>, %arg5: memref<2x1x1x8x8xbf16, #tpu.memory_space<vmem>>, %arg6: memref<1x1x8x8xf32, #tpu.memory_space<vmem>>, %arg7: memref<8x8xf32, #tpu.memory_space<vmem>>, %arg8: memref<8x8xf32, #tpu.memory_space<vmem>>, %arg9: memref<8x8xf32, #tpu.memory_space<vmem>>, %arg10: memref<8x8xf32, #tpu.memory_space<vmem>>, %arg11: memref<1x1x8x8xbf16, #tpu.memory_space<vmem>>, %arg12: memref<8x1xf32, #tpu.memory_space<vmem>>, %arg13: memref<8x1xf32, #tpu.memory_space<vmem>>, %arg14: memref<8x8xf32, #tpu.memory_space<vmem>>) attributes {dimension_semantics = [#tpu.dimension_semantics<parallel>, #tpu.dimension_semantics<parallel>, #tpu.dimension_semantics<parallel>, #tpu.dimension_semantics<arbitrary>], iteration_bounds = array<i64: 2, 4, 1, 1>, scalar_prefetch = 0 : i64, scratch_operands = 3 : i64, tpu.core_type = #tpu.core_type<tc>, window_params = [{transform_indices = @transform_0, window_bounds = array<i64: 1, 1, 8, 8>}, {transform_indices = @transform_1, window_bounds = array<i64: 2, 1, 1, 8, 8>}, {transform_indices = @transform_2, window_bounds = array<i64: 1, 1, 8, 8>}, {transform_indices = @transform_3, window_bounds = array<i64: 8, 8>}, {transform_indices = @transform_4, window_bounds = array<i64: 8, 8>}, {transform_indices = @transform_5, window_bounds = array<i64: 8, 8>}, {transform_indices = @transform_6, window_bounds = array<i64: 8, 8>}, {transform_indices = @transform_7, window_bounds = array<i64: 1, 1, 8, 8>}]} {
    %c0_i32 = arith.constant 0 : i32
    %0 = arith.cmpi eq, %arg3, %c0_i32 : i32
    %1 = arith.extui %0 : i1 to i32
    %c0_i32_0 = arith.constant 0 : i32
    %2 = arith.cmpi ne, %1, %c0_i32_0 : i32
    scf.if %2 {
      %cst_45 = arith.constant 0xFF800000 : f32
      %65 = vector.broadcast %cst_45 : f32 to vector<8x1xf32>
      %c0_46 = arith.constant 0 : index
      %c0_47 = arith.constant 0 : index
      %66 = vector.load %arg12[%c0_46, %c0_47] : memref<8x1xf32, #tpu.memory_space<vmem>>, vector<8x1xf32>
      tpu.vector_store %arg12[%c0_46, %c0_47], %65 {strides = array<i32>} : memref<8x1xf32, #tpu.memory_space<vmem>>, vector<8x1xf32>,
      %cst_48 = arith.constant 0.000000e+00 : f32
      %67 = vector.broadcast %cst_48 : f32 to vector<8x1xf32>
      %c0_49 = arith.constant 0 : index
      %c0_50 = arith.constant 0 : index
      %68 = vector.load %arg13[%c0_49, %c0_50] : memref<8x1xf32, #tpu.memory_space<vmem>>, vector<8x1xf32>
      tpu.vector_store %arg13[%c0_49, %c0_50], %67 {strides = array<i32>} : memref<8x1xf32, #tpu.memory_space<vmem>>, vector<8x1xf32>,
      %cst_51 = arith.constant 0.000000e+00 : f32
      %69 = vector.broadcast %cst_51 : f32 to vector<8x8xf32>
      %c0_52 = arith.constant 0 : index
      %c0_53 = arith.constant 0 : index
      %70 = vector.load %arg14[%c0_52, %c0_53] : memref<8x8xf32, #tpu.memory_space<vmem>>, vector<8x8xf32>
      tpu.vector_store %arg14[%c0_52, %c0_53], %69 {strides = array<i32>} : memref<8x8xf32, #tpu.memory_space<vmem>>, vector<8x8xf32>,
    } else {
    }
    %c0 = arith.constant 0 : index
    %c0_1 = arith.constant 0 : index
    %c0_2 = arith.constant 0 : index
    %c0_3 = arith.constant 0 : index
    %3 = vector.load %arg4[%c0, %c0_1, %c0_2, %c0_3] : memref<1x1x8x8xbf16, #tpu.memory_space<vmem>>, vector<1x1x8x8xbf16>
    %4 = vector.shape_cast %3 : vector<1x1x8x8xbf16> to vector<8x8xbf16>
    %5 = arith.extf %4 : vector<8x8xbf16> to vector<8x8xf32>
    %c0_4 = arith.constant 0 : index
    %c0_5 = arith.constant 0 : index
    %c0_6 = arith.constant 0 : index
    %c0_7 = arith.constant 0 : index
    %c0_8 = arith.constant 0 : index
    %6 = vector.load %arg5[%c0_4, %c0_5, %c0_6, %c0_7, %c0_8] : memref<2x1x1x8x8xbf16, #tpu.memory_space<vmem>>, vector<1x1x1x8x8xbf16>
    %7 = vector.shape_cast %6 : vector<1x1x1x8x8xbf16> to vector<8x8xbf16>
    %8 = arith.extf %7 : vector<8x8xbf16> to vector<8x8xf32>
    %c1 = arith.constant 1 : index
    %c0_9 = arith.constant 0 : index
    %c0_10 = arith.constant 0 : index
    %c0_11 = arith.constant 0 : index
    %c0_12 = arith.constant 0 : index
    %9 = vector.load %arg5[%c1, %c0_9, %c0_10, %c0_11, %c0_12] : memref<2x1x1x8x8xbf16, #tpu.memory_space<vmem>>, vector<1x1x1x8x8xbf16>
    %10 = vector.shape_cast %9 : vector<1x1x1x8x8xbf16> to vector<8x8xbf16>
    %c0_13 = arith.constant 0 : index
    %c0_14 = arith.constant 0 : index
    %11 = vector.load %arg7[%c0_13, %c0_14] : memref<8x8xf32, #tpu.memory_space<vmem>>, vector<8x8xf32>
    %12 = arith.mulf %5, %11 : vector<8x8xf32>
    %13 = vector.extract_strided_slice %5 {offsets = [0, 4], sizes = [8, 4], strides = [1, 1]} : vector<8x8xf32> to vector<8x4xf32>
    %cst = arith.constant 0.000000e+00 : f32
    %14 = vector.broadcast %cst : f32 to vector<8x4xf32>
    %15 = arith.subf %14, %13 : vector<8x4xf32>
    %16 = vector.extract_strided_slice %5 {offsets = [0, 0], sizes = [8, 4], strides = [1, 1]} : vector<8x8xf32> to vector<8x4xf32>
    %17 = tpu.concatenate %15, %16 in 1 : vector<8x4xf32>, vector<8x4xf32> -> vector<8x8xf32>
    %c0_15 = arith.constant 0 : index
    %c0_16 = arith.constant 0 : index
    %18 = vector.load %arg8[%c0_15, %c0_16] : memref<8x8xf32, #tpu.memory_space<vmem>>, vector<8x8xf32>
    %19 = arith.mulf %17, %18 : vector<8x8xf32>
    %20 = arith.addf %12, %19 : vector<8x8xf32>
    %c0_17 = arith.constant 0 : index
    %c0_18 = arith.constant 0 : index
    %21 = vector.load %arg9[%c0_17, %c0_18] : memref<8x8xf32, #tpu.memory_space<vmem>>, vector<8x8xf32>
    %22 = arith.mulf %8, %21 : vector<8x8xf32>
    %23 = vector.extract_strided_slice %8 {offsets = [0, 4], sizes = [8, 4], strides = [1, 1]} : vector<8x8xf32> to vector<8x4xf32>
    %cst_19 = arith.constant 0.000000e+00 : f32
    %24 = vector.broadcast %cst_19 : f32 to vector<8x4xf32>
    %25 = arith.subf %24, %23 : vector<8x4xf32>
    %26 = vector.extract_strided_slice %8 {offsets = [0, 0], sizes = [8, 4], strides = [1, 1]} : vector<8x8xf32> to vector<8x4xf32>
    %27 = tpu.concatenate %25, %26 in 1 : vector<8x4xf32>, vector<8x4xf32> -> vector<8x8xf32>
    %c0_20 = arith.constant 0 : index
    %c0_21 = arith.constant 0 : index
    %28 = vector.load %arg10[%c0_20, %c0_21] : memref<8x8xf32, #tpu.memory_space<vmem>>, vector<8x8xf32>
    %29 = arith.mulf %27, %28 : vector<8x8xf32>
    %30 = arith.addf %22, %29 : vector<8x8xf32>
    %cst_22 = arith.constant 0.353553385 : f32
    %31 = vector.broadcast %cst_22 : f32 to vector<8x8xf32>
    %32 = arith.mulf %20, %31 : vector<8x8xf32>
    %33 = arith.truncf %32 : vector<8x8xf32> to vector<8x8xbf16>
    %34 = arith.truncf %30 : vector<8x8xf32> to vector<8x8xbf16>
    %cst_23 = arith.constant dense<0.000000e+00> : vector<8x8xf32>
    %35 = tpu.matmul %33, %34, %cst_23 {dimension_numbers = #tpu.dot_dimension_numbers<[1], [1], [0], [0], [0, 0, 1, 0], [], []>} : vector<8x8xbf16>, vector<8x8xbf16>, vector<8x8xf32> -> vector<8x8xf32>
    %c0_24 = arith.constant 0 : index
    %c0_25 = arith.constant 0 : index
    %c0_26 = arith.constant 0 : index
    %c0_27 = arith.constant 0 : index
    %36 = vector.load %arg6[%c0_24, %c0_25, %c0_26, %c0_27] : memref<1x1x8x8xf32, #tpu.memory_space<vmem>>, vector<1x1x8x8xf32>
    %37 = vector.shape_cast %36 : vector<1x1x8x8xf32> to vector<8x8xf32>
    %38 = arith.addf %35, %37 : vector<8x8xf32>
    %c0_28 = arith.constant 0 : index
    %c0_29 = arith.constant 0 : index
    %39 = vector.load %arg12[%c0_28, %c0_29] : memref<8x1xf32, #tpu.memory_space<vmem>>, vector<8x1xf32>
    %cst_30 = arith.constant dense<0xFF800000> : vector<8xf32>
    %40 = vector.multi_reduction <maximumf>, %38, %cst_30 [1] : vector<8x8xf32> to vector<8xf32>
    %41 = vector.shape_cast %40 : vector<8xf32> to vector<8x1xf32>
    %42 = arith.maximumf %39, %41 : vector<8x1xf32>
    %43 = arith.subf %39, %42 : vector<8x1xf32>
    %44 = math.exp %43 : vector<8x1xf32>
    %45 = vector.broadcast %42 : vector<8x1xf32> to vector<8x8xf32>
    %46 = arith.subf %38, %45 : vector<8x8xf32>
    %47 = math.exp %46 : vector<8x8xf32>
    %c0_31 = arith.constant 0 : index
    %c0_32 = arith.constant 0 : index
    %48 = vector.load %arg13[%c0_31, %c0_32] : memref<8x1xf32, #tpu.memory_space<vmem>>, vector<8x1xf32>
    %49 = arith.mulf %44, %48 : vector<8x1xf32>
    %cst_33 = arith.constant dense<0.000000e+00> : vector<8xf32>
    %50 = vector.multi_reduction <add>, %47, %cst_33 [1] : vector<8x8xf32> to vector<8xf32>
    %51 = vector.shape_cast %50 : vector<8xf32> to vector<8x1xf32>
    %52 = arith.addf %49, %51 : vector<8x1xf32>
    %c0_34 = arith.constant 0 : index
    %c0_35 = arith.constant 0 : index
    %53 = vector.load %arg13[%c0_34, %c0_35] : memref<8x1xf32, #tpu.memory_space<vmem>>, vector<8x1xf32>
    tpu.vector_store %arg13[%c0_34, %c0_35], %52 {strides = array<i32>} : memref<8x1xf32, #tpu.memory_space<vmem>>, vector<8x1xf32>,
    %c0_36 = arith.constant 0 : index
    %c0_37 = arith.constant 0 : index
    %54 = vector.load %arg14[%c0_36, %c0_37] : memref<8x8xf32, #tpu.memory_space<vmem>>, vector<8x8xf32>
    %55 = vector.broadcast %44 : vector<8x1xf32> to vector<8x8xf32>
    %56 = arith.mulf %55, %54 : vector<8x8xf32>
    %57 = arith.truncf %47 : vector<8x8xf32> to vector<8x8xbf16>
    %cst_38 = arith.constant dense<0.000000e+00> : vector<8x8xf32>
    %58 = tpu.matmul %57, %10, %cst_38 {dimension_numbers = #tpu.dot_dimension_numbers<[1], [0], [0], [1], [0, 0, 1, 1], [], []>} : vector<8x8xbf16>, vector<8x8xbf16>, vector<8x8xf32> -> vector<8x8xf32>
    %59 = arith.addf %56, %58 : vector<8x8xf32>
    %c0_39 = arith.constant 0 : index
    %c0_40 = arith.constant 0 : index
    %60 = vector.load %arg14[%c0_39, %c0_40] : memref<8x8xf32, #tpu.memory_space<vmem>>, vector<8x8xf32>
    tpu.vector_store %arg14[%c0_39, %c0_40], %59 {strides = array<i32>} : memref<8x8xf32, #tpu.memory_space<vmem>>, vector<8x8xf32>,
    %c0_41 = arith.constant 0 : index
    %c0_42 = arith.constant 0 : index
    %61 = vector.load %arg12[%c0_41, %c0_42] : memref<8x1xf32, #tpu.memory_space<vmem>>, vector<8x1xf32>
    tpu.vector_store %arg12[%c0_41, %c0_42], %42 {strides = array<i32>} : memref<8x1xf32, #tpu.memory_space<vmem>>, vector<8x1xf32>,
    %c0_i32_43 = arith.constant 0 : i32
    %62 = arith.cmpi eq, %arg3, %c0_i32_43 : i32
    %63 = arith.extui %62 : i1 to i32
    %c0_i32_44 = arith.constant 0 : i32
    %64 = arith.cmpi ne, %63, %c0_i32_44 : i32
    scf.if %64 {
      %c0_45 = arith.constant 0 : index
      %c0_46 = arith.constant 0 : index
      %65 = vector.load %arg13[%c0_45, %c0_46] : memref<8x1xf32, #tpu.memory_space<vmem>>, vector<8x1xf32>
      %66 = tpu.reciprocal %65 {approx = true} : vector<8x1xf32> -> vector<8x1xf32>
      %c0_47 = arith.constant 0 : index
      %c0_48 = arith.constant 0 : index
      %67 = vector.load %arg14[%c0_47, %c0_48] : memref<8x8xf32, #tpu.memory_space<vmem>>, vector<8x8xf32>
      %68 = vector.broadcast %66 : vector<8x1xf32> to vector<8x8xf32>
      %69 = arith.mulf %67, %68 : vector<8x8xf32>
      %70 = arith.truncf %69 : vector<8x8xf32> to vector<8x8xbf16>
      %c0_49 = arith.constant 0 : index
      %c0_50 = arith.constant 0 : index
      %c0_51 = arith.constant 0 : index
      %c0_52 = arith.constant 0 : index
      %71 = vector.load %arg11[%c0_49, %c0_50, %c0_51, %c0_52] : memref<1x1x8x8xbf16, #tpu.memory_space<vmem>>, vector<1x1x8x8xbf16>
      %72 = vector.shape_cast %71 : vector<1x1x8x8xbf16> to vector<8x8xbf16>
      %73 = vector.shape_cast %70 : vector<8x8xbf16> to vector<1x1x8x8xbf16>
      tpu.vector_store %arg11[%c0_49, %c0_50, %c0_51, %c0_52], %73 {strides = array<i32>} : memref<1x1x8x8xbf16, #tpu.memory_space<vmem>>, vector<1x1x8x8xbf16>,
    } else {
    }
    return
  }
  func.func @transform_0(%arg0: i32, %arg1: i32, %arg2: i32, %arg3: i32) -> (i32, i32, i32, i32) {
    %c0_i32 = arith.constant 0 : i32
    %c0_i32_0 = arith.constant 0 : i32
    return %arg0, %arg1, %arg2, %c0_i32 : i32, i32, i32, i32
  }
  func.func @transform_1(%arg0: i32, %arg1: i32, %arg2: i32, %arg3: i32) -> (i32, i32, i32, i32, i32) {
    %c0_i32 = arith.constant 0 : i32
    %c0_i32_0 = arith.constant 0 : i32
    %c0_i32_1 = arith.constant 0 : i32
    return %c0_i32, %arg0, %arg1, %arg3, %c0_i32_0 : i32, i32, i32, i32, i32
  }
  func.func @transform_2(%arg0: i32, %arg1: i32, %arg2: i32, %arg3: i32) -> (i32, i32, i32, i32) {
    %c0_i32 = arith.constant 0 : i32
    %c0_i32_0 = arith.constant 0 : i32
    return %arg0, %c0_i32, %arg2, %arg3 : i32, i32, i32, i32
  }
  func.func @transform_3(%arg0: i32, %arg1: i32, %arg2: i32, %arg3: i32) -> (i32, i32) {
    %c0_i32 = arith.constant 0 : i32
    %c0_i32_0 = arith.constant 0 : i32
    return %arg2, %c0_i32 : i32, i32
  }
  func.func @transform_4(%arg0: i32, %arg1: i32, %arg2: i32, %arg3: i32) -> (i32, i32) {
    %c0_i32 = arith.constant 0 : i32
    %c0_i32_0 = arith.constant 0 : i32
    return %arg2, %c0_i32 : i32, i32
  }
  func.func @transform_5(%arg0: i32, %arg1: i32, %arg2: i32, %arg3: i32) -> (i32, i32) {
    %c0_i32 = arith.constant 0 : i32
    %c0_i32_0 = arith.constant 0 : i32
    return %arg3, %c0_i32 : i32, i32
  }
  func.func @transform_6(%arg0: i32, %arg1: i32, %arg2: i32, %arg3: i32) -> (i32, i32) {
    %c0_i32 = arith.constant 0 : i32
    %c0_i32_0 = arith.constant 0 : i32
    return %arg3, %c0_i32 : i32, i32
  }
  func.func @transform_7(%arg0: i32, %arg1: i32, %arg2: i32, %arg3: i32) -> (i32, i32, i32, i32) {
    %c0_i32 = arith.constant 0 : i32
    %c0_i32_0 = arith.constant 0 : i32
    return %arg0, %arg1, %arg2, %c0_i32 : i32, i32, i32, i32
  }
}

module attributes {stable_mosaic.version = 11 : i64} {
  func.func @_matmul_kernel(%arg0: i32, %arg1: i32, %arg2: i32, %arg3: memref<16x32xbf16, #tpu.memory_space<vmem>>, %arg4: memref<32x32xbf16, #tpu.memory_space<vmem>>, %arg5: memref<16x32xbf16, #tpu.memory_space<vmem>>, %arg6: memref<16x32xbf16, #tpu.memory_space<vmem>>, %arg7: memref<16x32xf32, #tpu.memory_space<vmem>>) attributes {dimension_semantics = [#tpu.dimension_semantics<parallel>, #tpu.dimension_semantics<parallel>, #tpu.dimension_semantics<arbitrary>], iteration_bounds = array<i64: 1, 1, 1>, scalar_prefetch = 0 : i64, scratch_operands = 1 : i64, tpu.core_type = #tpu.core_type<tc>, window_params = [{transform_indices = @transform_0, window_bounds = array<i64: 16, 32>}, {transform_indices = @transform_1, window_bounds = array<i64: 32, 32>}, {transform_indices = @transform_2, window_bounds = array<i64: 16, 32>}, {transform_indices = @transform_3, window_bounds = array<i64: 16, 32>}]} {
    %c0_i32 = arith.constant 0 : i32
    %0 = arith.cmpi eq, %arg2, %c0_i32 : i32
    %1 = arith.extui %0 : i1 to i32
    %c0_i32_0 = arith.constant 0 : i32
    %2 = arith.cmpi ne, %1, %c0_i32_0 : i32
    scf.if %2 {
      %cst_10 = arith.constant 0.000000e+00 : f32
      %12 = vector.broadcast %cst_10 : f32 to vector<16x32xf32>
      %c0_11 = arith.constant 0 : index
      %c0_12 = arith.constant 0 : index
      %13 = vector.load %arg7[%c0_11, %c0_12] : memref<16x32xf32, #tpu.memory_space<vmem>>, vector<16x32xf32>
      tpu.vector_store %arg7[%c0_11, %c0_12], %12 {strides = array<i32>} : memref<16x32xf32, #tpu.memory_space<vmem>>, vector<16x32xf32>,
    } else {
    }
    %c0 = arith.constant 0 : index
    %c0_1 = arith.constant 0 : index
    %3 = vector.load %arg7[%c0, %c0_1] : memref<16x32xf32, #tpu.memory_space<vmem>>, vector<16x32xf32>
    %c0_2 = arith.constant 0 : index
    %c0_3 = arith.constant 0 : index
    %4 = vector.load %arg3[%c0_2, %c0_3] : memref<16x32xbf16, #tpu.memory_space<vmem>>, vector<16x32xbf16>
    %c0_4 = arith.constant 0 : index
    %c0_5 = arith.constant 0 : index
    %5 = vector.load %arg4[%c0_4, %c0_5] : memref<32x32xbf16, #tpu.memory_space<vmem>>, vector<32x32xbf16>
    %cst = arith.constant dense<0.000000e+00> : vector<16x32xf32>
    %6 = tpu.matmul %4, %5, %cst {dimension_numbers = #tpu.dot_dimension_numbers<[1], [0], [0], [1], [0, 0, 1, 1], [], []>} : vector<16x32xbf16>, vector<32x32xbf16>, vector<16x32xf32> -> vector<16x32xf32>
    %7 = arith.addf %3, %6 : vector<16x32xf32>
    %c0_6 = arith.constant 0 : index
    %c0_7 = arith.constant 0 : index
    %8 = vector.load %arg7[%c0_6, %c0_7] : memref<16x32xf32, #tpu.memory_space<vmem>>, vector<16x32xf32>
    tpu.vector_store %arg7[%c0_6, %c0_7], %7 {strides = array<i32>} : memref<16x32xf32, #tpu.memory_space<vmem>>, vector<16x32xf32>,
    %c0_i32_8 = arith.constant 0 : i32
    %9 = arith.cmpi eq, %arg2, %c0_i32_8 : i32
    %10 = arith.extui %9 : i1 to i32
    %c0_i32_9 = arith.constant 0 : i32
    %11 = arith.cmpi ne, %10, %c0_i32_9 : i32
    scf.if %11 {
      %c0_10 = arith.constant 0 : index
      %c0_11 = arith.constant 0 : index
      %12 = vector.load %arg7[%c0_10, %c0_11] : memref<16x32xf32, #tpu.memory_space<vmem>>, vector<16x32xf32>
      %c0_12 = arith.constant 0 : index
      %c0_13 = arith.constant 0 : index
      %13 = vector.load %arg5[%c0_12, %c0_13] : memref<16x32xbf16, #tpu.memory_space<vmem>>, vector<16x32xbf16>
      %14 = arith.extf %13 : vector<16x32xbf16> to vector<16x32xf32>
      %15 = arith.addf %12, %14 : vector<16x32xf32>
      %16 = arith.truncf %15 : vector<16x32xf32> to vector<16x32xbf16>
      %c0_14 = arith.constant 0 : index
      %c0_15 = arith.constant 0 : index
      %17 = vector.load %arg6[%c0_14, %c0_15] : memref<16x32xbf16, #tpu.memory_space<vmem>>, vector<16x32xbf16>
      tpu.vector_store %arg6[%c0_14, %c0_15], %16 {strides = array<i32>} : memref<16x32xbf16, #tpu.memory_space<vmem>>, vector<16x32xbf16>,
    } else {
    }
    return
  }
  func.func @transform_0(%arg0: i32, %arg1: i32, %arg2: i32) -> (i32, i32) {
    %c0_i32 = arith.constant 0 : i32
    return %arg0, %arg2 : i32, i32
  }
  func.func @transform_1(%arg0: i32, %arg1: i32, %arg2: i32) -> (i32, i32) {
    %c0_i32 = arith.constant 0 : i32
    return %arg2, %arg1 : i32, i32
  }
  func.func @transform_2(%arg0: i32, %arg1: i32, %arg2: i32) -> (i32, i32) {
    %c0_i32 = arith.constant 0 : i32
    return %arg0, %arg1 : i32, i32
  }
  func.func @transform_3(%arg0: i32, %arg1: i32, %arg2: i32) -> (i32, i32) {
    %c0_i32 = arith.constant 0 : i32
    return %arg0, %arg1 : i32, i32
  }
}

module attributes {stable_mosaic.version = 11 : i64} {
  func.func @_geglu_kernel(%arg0: i32, %arg1: i32, %arg2: memref<16x32xbf16, #tpu.memory_space<vmem>>, %arg3: memref<1x32xbf16, #tpu.memory_space<vmem>>, %arg4: memref<32x64xbf16, #tpu.memory_space<vmem>>, %arg5: memref<32x64xbf16, #tpu.memory_space<vmem>>, %arg6: memref<64x32xbf16, #tpu.memory_space<vmem>>, %arg7: memref<16x32xbf16, #tpu.memory_space<vmem>>, %arg8: memref<16x32xbf16, #tpu.memory_space<vmem>>, %arg9: memref<16x32xf32, #tpu.memory_space<vmem>>) attributes {dimension_semantics = [#tpu.dimension_semantics<parallel>, #tpu.dimension_semantics<arbitrary>], iteration_bounds = array<i64: 1, 1>, scalar_prefetch = 0 : i64, scratch_operands = 2 : i64, tpu.core_type = #tpu.core_type<tc>, window_params = [{transform_indices = @transform_0, window_bounds = array<i64: 16, 32>}, {pipeline_mode = #tpu.pipeline_mode<synchronous>, transform_indices = @transform_1, window_bounds = array<i64: 1, 32>}, {transform_indices = @transform_2, window_bounds = array<i64: 32, 64>}, {transform_indices = @transform_3, window_bounds = array<i64: 32, 64>}, {transform_indices = @transform_4, window_bounds = array<i64: 64, 32>}, {transform_indices = @transform_5, window_bounds = array<i64: 16, 32>}]} {
    %c0_i32 = arith.constant 0 : i32
    %0 = arith.cmpi eq, %arg1, %c0_i32 : i32
    %1 = arith.extui %0 : i1 to i32
    %c0_i32_0 = arith.constant 0 : i32
    %2 = arith.cmpi ne, %1, %c0_i32_0 : i32
    scf.if %2 {
      %c0_20 = arith.constant 0 : index
      %c0_21 = arith.constant 0 : index
      %31 = vector.load %arg2[%c0_20, %c0_21] : memref<16x32xbf16, #tpu.memory_space<vmem>>, vector<16x32xbf16>
      %32 = arith.extf %31 : vector<16x32xbf16> to vector<16x32xf32>
      %33 = arith.mulf %32, %32 : vector<16x32xf32>
      %cst_22 = arith.constant dense<0.000000e+00> : vector<16xf32>
      %34 = vector.multi_reduction <add>, %33, %cst_22 [1] : vector<16x32xf32> to vector<16xf32>
      %35 = vector.shape_cast %34 : vector<16xf32> to vector<16x1xf32>
      %cst_23 = arith.constant 3.200000e+01 : f32
      %36 = vector.broadcast %cst_23 : f32 to vector<16x1xf32>
      %37 = arith.divf %35, %36 : vector<16x1xf32>
      %cst_24 = arith.constant 9.99999997E-7 : f32
      %38 = vector.broadcast %cst_24 : f32 to vector<16x1xf32>
      %39 = arith.addf %37, %38 : vector<16x1xf32>
      %40 = math.rsqrt %39 : vector<16x1xf32>
      %41 = vector.broadcast %40 : vector<16x1xf32> to vector<16x32xf32>
      %42 = arith.mulf %32, %41 : vector<16x32xf32>
      %c0_25 = arith.constant 0 : index
      %c0_26 = arith.constant 0 : index
      %43 = vector.load %arg3[%c0_25, %c0_26] : memref<1x32xbf16, #tpu.memory_space<vmem>>, vector<1x32xbf16>
      %44 = arith.extf %43 : vector<1x32xbf16> to vector<1x32xf32>
      %45 = vector.broadcast %44 : vector<1x32xf32> to vector<16x32xf32>
      %46 = arith.mulf %42, %45 : vector<16x32xf32>
      %47 = arith.truncf %46 : vector<16x32xf32> to vector<16x32xbf16>
      %c0_27 = arith.constant 0 : index
      %c0_28 = arith.constant 0 : index
      %48 = vector.load %arg8[%c0_27, %c0_28] : memref<16x32xbf16, #tpu.memory_space<vmem>>, vector<16x32xbf16>
      tpu.vector_store %arg8[%c0_27, %c0_28], %47 {strides = array<i32>} : memref<16x32xbf16, #tpu.memory_space<vmem>>, vector<16x32xbf16>,
      %cst_29 = arith.constant 0.000000e+00 : f32
      %49 = vector.broadcast %cst_29 : f32 to vector<16x32xf32>
      %c0_30 = arith.constant 0 : index
      %c0_31 = arith.constant 0 : index
      %50 = vector.load %arg9[%c0_30, %c0_31] : memref<16x32xf32, #tpu.memory_space<vmem>>, vector<16x32xf32>
      tpu.vector_store %arg9[%c0_30, %c0_31], %49 {strides = array<i32>} : memref<16x32xf32, #tpu.memory_space<vmem>>, vector<16x32xf32>,
    } else {
    }
    %c0 = arith.constant 0 : index
    %c0_1 = arith.constant 0 : index
    %3 = vector.load %arg8[%c0, %c0_1] : memref<16x32xbf16, #tpu.memory_space<vmem>>, vector<16x32xbf16>
    %c0_2 = arith.constant 0 : index
    %c0_3 = arith.constant 0 : index
    %4 = vector.load %arg4[%c0_2, %c0_3] : memref<32x64xbf16, #tpu.memory_space<vmem>>, vector<32x64xbf16>
    %cst = arith.constant dense<0.000000e+00> : vector<16x64xf32>
    %5 = tpu.matmul %3, %4, %cst {dimension_numbers = #tpu.dot_dimension_numbers<[1], [0], [0], [1], [0, 0, 1, 1], [], []>} : vector<16x32xbf16>, vector<32x64xbf16>, vector<16x64xf32> -> vector<16x64xf32>
    %c0_4 = arith.constant 0 : index
    %c0_5 = arith.constant 0 : index
    %6 = vector.load %arg5[%c0_4, %c0_5] : memref<32x64xbf16, #tpu.memory_space<vmem>>, vector<32x64xbf16>
    %cst_6 = arith.constant dense<0.000000e+00> : vector<16x64xf32>
    %7 = tpu.matmul %3, %6, %cst_6 {dimension_numbers = #tpu.dot_dimension_numbers<[1], [0], [0], [1], [0, 0, 1, 1], [], []>} : vector<16x32xbf16>, vector<32x64xbf16>, vector<16x64xf32> -> vector<16x64xf32>
    %8 = arith.mulf %5, %5 : vector<16x64xf32>
    %9 = arith.mulf %5, %8 : vector<16x64xf32>
    %cst_7 = arith.constant 4.471500e-02 : f32
    %10 = vector.broadcast %cst_7 : f32 to vector<16x64xf32>
    %11 = arith.mulf %10, %9 : vector<16x64xf32>
    %12 = arith.addf %5, %11 : vector<16x64xf32>
    %cst_8 = arith.constant 0.797884583 : f32
    %13 = vector.broadcast %cst_8 : f32 to vector<16x64xf32>
    %14 = arith.mulf %13, %12 : vector<16x64xf32>
    %15 = math.tanh %14 : vector<16x64xf32>
    %cst_9 = arith.constant 1.000000e+00 : f32
    %16 = vector.broadcast %cst_9 : f32 to vector<16x64xf32>
    %17 = arith.addf %16, %15 : vector<16x64xf32>
    %cst_10 = arith.constant 5.000000e-01 : f32
    %18 = vector.broadcast %cst_10 : f32 to vector<16x64xf32>
    %19 = arith.mulf %18, %17 : vector<16x64xf32>
    %20 = arith.mulf %5, %19 : vector<16x64xf32>
    %21 = arith.mulf %20, %7 : vector<16x64xf32>
    %c0_11 = arith.constant 0 : index
    %c0_12 = arith.constant 0 : index
    %22 = vector.load %arg9[%c0_11, %c0_12] : memref<16x32xf32, #tpu.memory_space<vmem>>, vector<16x32xf32>
    %23 = arith.truncf %21 : vector<16x64xf32> to vector<16x64xbf16>
    %c0_13 = arith.constant 0 : index
    %c0_14 = arith.constant 0 : index
    %24 = vector.load %arg6[%c0_13, %c0_14] : memref<64x32xbf16, #tpu.memory_space<vmem>>, vector<64x32xbf16>
    %cst_15 = arith.constant dense<0.000000e+00> : vector<16x32xf32>
    %25 = tpu.matmul %23, %24, %cst_15 {dimension_numbers = #tpu.dot_dimension_numbers<[1], [0], [0], [1], [0, 0, 1, 1], [], []>} : vector<16x64xbf16>, vector<64x32xbf16>, vector<16x32xf32> -> vector<16x32xf32>
    %26 = arith.addf %22, %25 : vector<16x32xf32>
    %c0_16 = arith.constant 0 : index
    %c0_17 = arith.constant 0 : index
    %27 = vector.load %arg9[%c0_16, %c0_17] : memref<16x32xf32, #tpu.memory_space<vmem>>, vector<16x32xf32>
    tpu.vector_store %arg9[%c0_16, %c0_17], %26 {strides = array<i32>} : memref<16x32xf32, #tpu.memory_space<vmem>>, vector<16x32xf32>,
    %c0_i32_18 = arith.constant 0 : i32
    %28 = arith.cmpi eq, %arg1, %c0_i32_18 : i32
    %29 = arith.extui %28 : i1 to i32
    %c0_i32_19 = arith.constant 0 : i32
    %30 = arith.cmpi ne, %29, %c0_i32_19 : i32
    scf.if %30 {
      %c0_20 = arith.constant 0 : index
      %c0_21 = arith.constant 0 : index
      %31 = vector.load %arg2[%c0_20, %c0_21] : memref<16x32xbf16, #tpu.memory_space<vmem>>, vector<16x32xbf16>
      %32 = arith.extf %31 : vector<16x32xbf16> to vector<16x32xf32>
      %c0_22 = arith.constant 0 : index
      %c0_23 = arith.constant 0 : index
      %33 = vector.load %arg9[%c0_22, %c0_23] : memref<16x32xf32, #tpu.memory_space<vmem>>, vector<16x32xf32>
      %34 = arith.addf %32, %33 : vector<16x32xf32>
      %35 = arith.truncf %34 : vector<16x32xf32> to vector<16x32xbf16>
      %c0_24 = arith.constant 0 : index
      %c0_25 = arith.constant 0 : index
      %36 = vector.load %arg7[%c0_24, %c0_25] : memref<16x32xbf16, #tpu.memory_space<vmem>>, vector<16x32xbf16>
      tpu.vector_store %arg7[%c0_24, %c0_25], %35 {strides = array<i32>} : memref<16x32xbf16, #tpu.memory_space<vmem>>, vector<16x32xbf16>,
    } else {
    }
    return
  }
  func.func @transform_0(%arg0: i32, %arg1: i32) -> (i32, i32) {
    %c0_i32 = arith.constant 0 : i32
    %c0_i32_0 = arith.constant 0 : i32
    return %arg0, %c0_i32 : i32, i32
  }
  func.func @transform_1(%arg0: i32, %arg1: i32) -> (i32, i32) {
    %c0_i32 = arith.constant 0 : i32
    %c0_i32_0 = arith.constant 0 : i32
    %c0_i32_1 = arith.constant 0 : i32
    return %c0_i32, %c0_i32_0 : i32, i32
  }
  func.func @transform_2(%arg0: i32, %arg1: i32) -> (i32, i32) {
    %c0_i32 = arith.constant 0 : i32
    %c0_i32_0 = arith.constant 0 : i32
    return %c0_i32, %arg1 : i32, i32
  }
  func.func @transform_3(%arg0: i32, %arg1: i32) -> (i32, i32) {
    %c0_i32 = arith.constant 0 : i32
    %c0_i32_0 = arith.constant 0 : i32
    return %c0_i32, %arg1 : i32, i32
  }
  func.func @transform_4(%arg0: i32, %arg1: i32) -> (i32, i32) {
    %c0_i32 = arith.constant 0 : i32
    %c0_i32_0 = arith.constant 0 : i32
    return %arg1, %c0_i32 : i32, i32
  }
  func.func @transform_5(%arg0: i32, %arg1: i32) -> (i32, i32) {
    %c0_i32 = arith.constant 0 : i32
    %c0_i32_0 = arith.constant 0 : i32
    return %arg0, %c0_i32 : i32, i32
  }
}

module attributes {stable_mosaic.version = 11 : i64} {
  func.func @_rms_linear_kernel(%arg0: i32, %arg1: i32, %arg2: memref<16x32xbf16, #tpu.memory_space<vmem>>, %arg3: memref<1x32xbf16, #tpu.memory_space<vmem>>, %arg4: memref<32x32xbf16, #tpu.memory_space<vmem>>, %arg5: memref<16x32xbf16, #tpu.memory_space<vmem>>) attributes {dimension_semantics = [#tpu.dimension_semantics<parallel>, #tpu.dimension_semantics<parallel>], iteration_bounds = array<i64: 1, 1>, scalar_prefetch = 0 : i64, scratch_operands = 0 : i64, tpu.core_type = #tpu.core_type<tc>, window_params = [{transform_indices = @transform_0, window_bounds = array<i64: 16, 32>}, {pipeline_mode = #tpu.pipeline_mode<synchronous>, transform_indices = @transform_1, window_bounds = array<i64: 1, 32>}, {transform_indices = @transform_2, window_bounds = array<i64: 32, 32>}, {transform_indices = @transform_3, window_bounds = array<i64: 16, 32>}]} {
    %c0 = arith.constant 0 : index
    %c0_0 = arith.constant 0 : index
    %0 = vector.load %arg2[%c0, %c0_0] : memref<16x32xbf16, #tpu.memory_space<vmem>>, vector<16x32xbf16>
    %1 = arith.extf %0 : vector<16x32xbf16> to vector<16x32xf32>
    %2 = arith.mulf %1, %1 : vector<16x32xf32>
    %cst = arith.constant dense<0.000000e+00> : vector<16xf32>
    %3 = vector.multi_reduction <add>, %2, %cst [1] : vector<16x32xf32> to vector<16xf32>
    %4 = vector.shape_cast %3 : vector<16xf32> to vector<16x1xf32>
    %cst_1 = arith.constant 3.200000e+01 : f32
    %5 = vector.broadcast %cst_1 : f32 to vector<16x1xf32>
    %6 = arith.divf %4, %5 : vector<16x1xf32>
    %cst_2 = arith.constant 9.99999974E-6 : f32
    %7 = vector.broadcast %cst_2 : f32 to vector<16x1xf32>
    %8 = arith.addf %6, %7 : vector<16x1xf32>
    %9 = math.rsqrt %8 : vector<16x1xf32>
    %10 = vector.broadcast %9 : vector<16x1xf32> to vector<16x32xf32>
    %11 = arith.mulf %1, %10 : vector<16x32xf32>
    %c0_3 = arith.constant 0 : index
    %c0_4 = arith.constant 0 : index
    %12 = vector.load %arg3[%c0_3, %c0_4] : memref<1x32xbf16, #tpu.memory_space<vmem>>, vector<1x32xbf16>
    %13 = arith.extf %12 : vector<1x32xbf16> to vector<1x32xf32>
    %14 = vector.broadcast %13 : vector<1x32xf32> to vector<16x32xf32>
    %15 = arith.mulf %11, %14 : vector<16x32xf32>
    %16 = arith.truncf %15 : vector<16x32xf32> to vector<16x32xbf16>
    %c0_5 = arith.constant 0 : index
    %c0_6 = arith.constant 0 : index
    %17 = vector.load %arg4[%c0_5, %c0_6] : memref<32x32xbf16, #tpu.memory_space<vmem>>, vector<32x32xbf16>
    %cst_7 = arith.constant dense<0.000000e+00> : vector<16x32xf32>
    %18 = tpu.matmul %16, %17, %cst_7 {dimension_numbers = #tpu.dot_dimension_numbers<[1], [0], [0], [1], [0, 0, 1, 1], [], []>} : vector<16x32xbf16>, vector<32x32xbf16>, vector<16x32xf32> -> vector<16x32xf32>
    %19 = arith.truncf %18 : vector<16x32xf32> to vector<16x32xbf16>
    %c0_8 = arith.constant 0 : index
    %c0_9 = arith.constant 0 : index
    %20 = vector.load %arg5[%c0_8, %c0_9] : memref<16x32xbf16, #tpu.memory_space<vmem>>, vector<16x32xbf16>
    tpu.vector_store %arg5[%c0_8, %c0_9], %19 {strides = array<i32>} : memref<16x32xbf16, #tpu.memory_space<vmem>>, vector<16x32xbf16>,
    return
  }
  func.func @transform_0(%arg0: i32, %arg1: i32) -> (i32, i32) {
    %c0_i32 = arith.constant 0 : i32
    %c0_i32_0 = arith.constant 0 : i32
    return %arg0, %c0_i32 : i32, i32
  }
  func.func @transform_1(%arg0: i32, %arg1: i32) -> (i32, i32) {
    %c0_i32 = arith.constant 0 : i32
    %c0_i32_0 = arith.constant 0 : i32
    %c0_i32_1 = arith.constant 0 : i32
    return %c0_i32, %c0_i32_0 : i32, i32
  }
  func.func @transform_2(%arg0: i32, %arg1: i32) -> (i32, i32) {
    %c0_i32 = arith.constant 0 : i32
    %c0_i32_0 = arith.constant 0 : i32
    return %c0_i32, %arg1 : i32, i32
  }
  func.func @transform_3(%arg0: i32, %arg1: i32) -> (i32, i32) {
    %c0_i32 = arith.constant 0 : i32
    return %arg0, %arg1 : i32, i32
  }
}

module attributes {stable_mosaic.version = 11 : i64} {
  func.func @_matmul_kernel(%arg0: i32, %arg1: i32, %arg2: i32, %arg3: memref<16x32xbf16, #tpu.memory_space<vmem>>, %arg4: memref<32x64xbf16, #tpu.memory_space<vmem>>, %arg5: memref<16x64xbf16, #tpu.memory_space<vmem>>, %arg6: memref<16x64xf32, #tpu.memory_space<vmem>>) attributes {dimension_semantics = [#tpu.dimension_semantics<parallel>, #tpu.dimension_semantics<parallel>, #tpu.dimension_semantics<arbitrary>], iteration_bounds = array<i64: 1, 1, 1>, scalar_prefetch = 0 : i64, scratch_operands = 1 : i64, tpu.core_type = #tpu.core_type<tc>, window_params = [{transform_indices = @transform_0, window_bounds = array<i64: 16, 32>}, {transform_indices = @transform_1, window_bounds = array<i64: 32, 64>}, {transform_indices = @transform_2, window_bounds = array<i64: 16, 64>}]} {
    %c0_i32 = arith.constant 0 : i32
    %0 = arith.cmpi eq, %arg2, %c0_i32 : i32
    %1 = arith.extui %0 : i1 to i32
    %c0_i32_0 = arith.constant 0 : i32
    %2 = arith.cmpi ne, %1, %c0_i32_0 : i32
    scf.if %2 {
      %cst_10 = arith.constant 0.000000e+00 : f32
      %12 = vector.broadcast %cst_10 : f32 to vector<16x64xf32>
      %c0_11 = arith.constant 0 : index
      %c0_12 = arith.constant 0 : index
      %13 = vector.load %arg6[%c0_11, %c0_12] : memref<16x64xf32, #tpu.memory_space<vmem>>, vector<16x64xf32>
      tpu.vector_store %arg6[%c0_11, %c0_12], %12 {strides = array<i32>} : memref<16x64xf32, #tpu.memory_space<vmem>>, vector<16x64xf32>,
    } else {
    }
    %c0 = arith.constant 0 : index
    %c0_1 = arith.constant 0 : index
    %3 = vector.load %arg6[%c0, %c0_1] : memref<16x64xf32, #tpu.memory_space<vmem>>, vector<16x64xf32>
    %c0_2 = arith.constant 0 : index
    %c0_3 = arith.constant 0 : index
    %4 = vector.load %arg3[%c0_2, %c0_3] : memref<16x32xbf16, #tpu.memory_space<vmem>>, vector<16x32xbf16>
    %c0_4 = arith.constant 0 : index
    %c0_5 = arith.constant 0 : index
    %5 = vector.load %arg4[%c0_4, %c0_5] : memref<32x64xbf16, #tpu.memory_space<vmem>>, vector<32x64xbf16>
    %cst = arith.constant dense<0.000000e+00> : vector<16x64xf32>
    %6 = tpu.matmul %4, %5, %cst {dimension_numbers = #tpu.dot_dimension_numbers<[1], [0], [0], [1], [0, 0, 1, 1], [], []>} : vector<16x32xbf16>, vector<32x64xbf16>, vector<16x64xf32> -> vector<16x64xf32>
    %7 = arith.addf %3, %6 : vector<16x64xf32>
    %c0_6 = arith.constant 0 : index
    %c0_7 = arith.constant 0 : index
    %8 = vector.load %arg6[%c0_6, %c0_7] : memref<16x64xf32, #tpu.memory_space<vmem>>, vector<16x64xf32>
    tpu.vector_store %arg6[%c0_6, %c0_7], %7 {strides = array<i32>} : memref<16x64xf32, #tpu.memory_space<vmem>>, vector<16x64xf32>,
    %c0_i32_8 = arith.constant 0 : i32
    %9 = arith.cmpi eq, %arg2, %c0_i32_8 : i32
    %10 = arith.extui %9 : i1 to i32
    %c0_i32_9 = arith.constant 0 : i32
    %11 = arith.cmpi ne, %10, %c0_i32_9 : i32
    scf.if %11 {
      %c0_10 = arith.constant 0 : index
      %c0_11 = arith.constant 0 : index
      %12 = vector.load %arg6[%c0_10, %c0_11] : memref<16x64xf32, #tpu.memory_space<vmem>>, vector<16x64xf32>
      %13 = arith.truncf %12 : vector<16x64xf32> to vector<16x64xbf16>
      %c0_12 = arith.constant 0 : index
      %c0_13 = arith.constant 0 : index
      %14 = vector.load %arg5[%c0_12, %c0_13] : memref<16x64xbf16, #tpu.memory_space<vmem>>, vector<16x64xbf16>
      tpu.vector_store %arg5[%c0_12, %c0_13], %13 {strides = array<i32>} : memref<16x64xbf16, #tpu.memory_space<vmem>>, vector<16x64xbf16>,
    } else {
    }
    return
  }
  func.func @transform_0(%arg0: i32, %arg1: i32, %arg2: i32) -> (i32, i32) {
    %c0_i32 = arith.constant 0 : i32
    return %arg0, %arg2 : i32, i32
  }
  func.func @transform_1(%arg0: i32, %arg1: i32, %arg2: i32) -> (i32, i32) {
    %c0_i32 = arith.constant 0 : i32
    return %arg2, %arg1 : i32, i32
  }
  func.func @transform_2(%arg0: i32, %arg1: i32, %arg2: i32) -> (i32, i32) {
    %c0_i32 = arith.constant 0 : i32
    return %arg0, %arg1 : i32, i32
  }
}

module attributes {stable_mosaic.version = 11 : i64} {
  func.func @_flash_attn_kernel(%arg0: i32, %arg1: i32, %arg2: i32, %arg3: i32, %arg4: memref<1x1x8x8xbf16, #tpu.memory_space<vmem>>, %arg5: memref<2x1x1x8x8xbf16, #tpu.memory_space<vmem>>, %arg6: memref<1x1x8x8xf32, #tpu.memory_space<vmem>>, %arg7: memref<1x1x8x8xbf16, #tpu.memory_space<vmem>>, %arg8: memref<8x1xf32, #tpu.memory_space<vmem>>, %arg9: memref<8x1xf32, #tpu.memory_space<vmem>>, %arg10: memref<8x8xf32, #tpu.memory_space<vmem>>) attributes {dimension_semantics = [#tpu.dimension_semantics<parallel>, #tpu.dimension_semantics<parallel>, #tpu.dimension_semantics<parallel>, #tpu.dimension_semantics<arbitrary>], iteration_bounds = array<i64: 2, 4, 1, 1>, scalar_prefetch = 0 : i64, scratch_operands = 3 : i64, tpu.core_type = #tpu.core_type<tc>, window_params = [{transform_indices = @transform_0, window_bounds = array<i64: 1, 1, 8, 8>}, {transform_indices = @transform_1, window_bounds = array<i64: 2, 1, 1, 8, 8>}, {transform_indices = @transform_2, window_bounds = array<i64: 1, 1, 8, 8>}, {transform_indices = @transform_3, window_bounds = array<i64: 1, 1, 8, 8>}]} {
    %c0_i32 = arith.constant 0 : i32
    %0 = arith.cmpi eq, %arg3, %c0_i32 : i32
    %1 = arith.extui %0 : i1 to i32
    %c0_i32_0 = arith.constant 0 : i32
    %2 = arith.cmpi ne, %1, %c0_i32_0 : i32
    scf.if %2 {
      %cst_35 = arith.constant 0xFF800000 : f32
      %45 = vector.broadcast %cst_35 : f32 to vector<8x1xf32>
      %c0_36 = arith.constant 0 : index
      %c0_37 = arith.constant 0 : index
      %46 = vector.load %arg8[%c0_36, %c0_37] : memref<8x1xf32, #tpu.memory_space<vmem>>, vector<8x1xf32>
      tpu.vector_store %arg8[%c0_36, %c0_37], %45 {strides = array<i32>} : memref<8x1xf32, #tpu.memory_space<vmem>>, vector<8x1xf32>,
      %cst_38 = arith.constant 0.000000e+00 : f32
      %47 = vector.broadcast %cst_38 : f32 to vector<8x1xf32>
      %c0_39 = arith.constant 0 : index
      %c0_40 = arith.constant 0 : index
      %48 = vector.load %arg9[%c0_39, %c0_40] : memref<8x1xf32, #tpu.memory_space<vmem>>, vector<8x1xf32>
      tpu.vector_store %arg9[%c0_39, %c0_40], %47 {strides = array<i32>} : memref<8x1xf32, #tpu.memory_space<vmem>>, vector<8x1xf32>,
      %cst_41 = arith.constant 0.000000e+00 : f32
      %49 = vector.broadcast %cst_41 : f32 to vector<8x8xf32>
      %c0_42 = arith.constant 0 : index
      %c0_43 = arith.constant 0 : index
      %50 = vector.load %arg10[%c0_42, %c0_43] : memref<8x8xf32, #tpu.memory_space<vmem>>, vector<8x8xf32>
      tpu.vector_store %arg10[%c0_42, %c0_43], %49 {strides = array<i32>} : memref<8x8xf32, #tpu.memory_space<vmem>>, vector<8x8xf32>,
    } else {
    }
    %c0 = arith.constant 0 : index
    %c0_1 = arith.constant 0 : index
    %c0_2 = arith.constant 0 : index
    %c0_3 = arith.constant 0 : index
    %3 = vector.load %arg4[%c0, %c0_1, %c0_2, %c0_3] : memref<1x1x8x8xbf16, #tpu.memory_space<vmem>>, vector<1x1x8x8xbf16>
    %4 = vector.shape_cast %3 : vector<1x1x8x8xbf16> to vector<8x8xbf16>
    %5 = arith.extf %4 : vector<8x8xbf16> to vector<8x8xf32>
    %c0_4 = arith.constant 0 : index
    %c0_5 = arith.constant 0 : index
    %c0_6 = arith.constant 0 : index
    %c0_7 = arith.constant 0 : index
    %c0_8 = arith.constant 0 : index
    %6 = vector.load %arg5[%c0_4, %c0_5, %c0_6, %c0_7, %c0_8] : memref<2x1x1x8x8xbf16, #tpu.memory_space<vmem>>, vector<1x1x1x8x8xbf16>
    %7 = vector.shape_cast %6 : vector<1x1x1x8x8xbf16> to vector<8x8xbf16>
    %8 = arith.extf %7 : vector<8x8xbf16> to vector<8x8xf32>
    %c1 = arith.constant 1 : index
    %c0_9 = arith.constant 0 : index
    %c0_10 = arith.constant 0 : index
    %c0_11 = arith.constant 0 : index
    %c0_12 = arith.constant 0 : index
    %9 = vector.load %arg5[%c1, %c0_9, %c0_10, %c0_11, %c0_12] : memref<2x1x1x8x8xbf16, #tpu.memory_space<vmem>>, vector<1x1x1x8x8xbf16>
    %10 = vector.shape_cast %9 : vector<1x1x1x8x8xbf16> to vector<8x8xbf16>
    %cst = arith.constant 0.353553385 : f32
    %11 = vector.broadcast %cst : f32 to vector<8x8xf32>
    %12 = arith.mulf %5, %11 : vector<8x8xf32>
    %13 = arith.truncf %12 : vector<8x8xf32> to vector<8x8xbf16>
    %14 = arith.truncf %8 : vector<8x8xf32> to vector<8x8xbf16>
    %cst_13 = arith.constant dense<0.000000e+00> : vector<8x8xf32>
    %15 = tpu.matmul %13, %14, %cst_13 {dimension_numbers = #tpu.dot_dimension_numbers<[1], [1], [0], [0], [0, 0, 1, 0], [], []>} : vector<8x8xbf16>, vector<8x8xbf16>, vector<8x8xf32> -> vector<8x8xf32>
    %c0_14 = arith.constant 0 : index
    %c0_15 = arith.constant 0 : index
    %c0_16 = arith.constant 0 : index
    %c0_17 = arith.constant 0 : index
    %16 = vector.load %arg6[%c0_14, %c0_15, %c0_16, %c0_17] : memref<1x1x8x8xf32, #tpu.memory_space<vmem>>, vector<1x1x8x8xf32>
    %17 = vector.shape_cast %16 : vector<1x1x8x8xf32> to vector<8x8xf32>
    %18 = arith.addf %15, %17 : vector<8x8xf32>
    %c0_18 = arith.constant 0 : index
    %c0_19 = arith.constant 0 : index
    %19 = vector.load %arg8[%c0_18, %c0_19] : memref<8x1xf32, #tpu.memory_space<vmem>>, vector<8x1xf32>
    %cst_20 = arith.constant dense<0xFF800000> : vector<8xf32>
    %20 = vector.multi_reduction <maximumf>, %18, %cst_20 [1] : vector<8x8xf32> to vector<8xf32>
    %21 = vector.shape_cast %20 : vector<8xf32> to vector<8x1xf32>
    %22 = arith.maximumf %19, %21 : vector<8x1xf32>
    %23 = arith.subf %19, %22 : vector<8x1xf32>
    %24 = math.exp %23 : vector<8x1xf32>
    %25 = vector.broadcast %22 : vector<8x1xf32> to vector<8x8xf32>
    %26 = arith.subf %18, %25 : vector<8x8xf32>
    %27 = math.exp %26 : vector<8x8xf32>
    %c0_21 = arith.constant 0 : index
    %c0_22 = arith.constant 0 : index
    %28 = vector.load %arg9[%c0_21, %c0_22] : memref<8x1xf32, #tpu.memory_space<vmem>>, vector<8x1xf32>
    %29 = arith.mulf %24, %28 : vector<8x1xf32>
    %cst_23 = arith.constant dense<0.000000e+00> : vector<8xf32>
    %30 = vector.multi_reduction <add>, %27, %cst_23 [1] : vector<8x8xf32> to vector<8xf32>
    %31 = vector.shape_cast %30 : vector<8xf32> to vector<8x1xf32>
    %32 = arith.addf %29, %31 : vector<8x1xf32>
    %c0_24 = arith.constant 0 : index
    %c0_25 = arith.constant 0 : index
    %33 = vector.load %arg9[%c0_24, %c0_25] : memref<8x1xf32, #tpu.memory_space<vmem>>, vector<8x1xf32>
    tpu.vector_store %arg9[%c0_24, %c0_25], %32 {strides = array<i32>} : memref<8x1xf32, #tpu.memory_space<vmem>>, vector<8x1xf32>,
    %c0_26 = arith.constant 0 : index
    %c0_27 = arith.constant 0 : index
    %34 = vector.load %arg10[%c0_26, %c0_27] : memref<8x8xf32, #tpu.memory_space<vmem>>, vector<8x8xf32>
    %35 = vector.broadcast %24 : vector<8x1xf32> to vector<8x8xf32>
    %36 = arith.mulf %35, %34 : vector<8x8xf32>
    %37 = arith.truncf %27 : vector<8x8xf32> to vector<8x8xbf16>
    %cst_28 = arith.constant dense<0.000000e+00> : vector<8x8xf32>
    %38 = tpu.matmul %37, %10, %cst_28 {dimension_numbers = #tpu.dot_dimension_numbers<[1], [0], [0], [1], [0, 0, 1, 1], [], []>} : vector<8x8xbf16>, vector<8x8xbf16>, vector<8x8xf32> -> vector<8x8xf32>
    %39 = arith.addf %36, %38 : vector<8x8xf32>
    %c0_29 = arith.constant 0 : index
    %c0_30 = arith.constant 0 : index
    %40 = vector.load %arg10[%c0_29, %c0_30] : memref<8x8xf32, #tpu.memory_space<vmem>>, vector<8x8xf32>
    tpu.vector_store %arg10[%c0_29, %c0_30], %39 {strides = array<i32>} : memref<8x8xf32, #tpu.memory_space<vmem>>, vector<8x8xf32>,
    %c0_31 = arith.constant 0 : index
    %c0_32 = arith.constant 0 : index
    %41 = vector.load %arg8[%c0_31, %c0_32] : memref<8x1xf32, #tpu.memory_space<vmem>>, vector<8x1xf32>
    tpu.vector_store %arg8[%c0_31, %c0_32], %22 {strides = array<i32>} : memref<8x1xf32, #tpu.memory_space<vmem>>, vector<8x1xf32>,
    %c0_i32_33 = arith.constant 0 : i32
    %42 = arith.cmpi eq, %arg3, %c0_i32_33 : i32
    %43 = arith.extui %42 : i1 to i32
    %c0_i32_34 = arith.constant 0 : i32
    %44 = arith.cmpi ne, %43, %c0_i32_34 : i32
    scf.if %44 {
      %c0_35 = arith.constant 0 : index
      %c0_36 = arith.constant 0 : index
      %45 = vector.load %arg9[%c0_35, %c0_36] : memref<8x1xf32, #tpu.memory_space<vmem>>, vector<8x1xf32>
      %46 = tpu.reciprocal %45 {approx = true} : vector<8x1xf32> -> vector<8x1xf32>
      %c0_37 = arith.constant 0 : index
      %c0_38 = arith.constant 0 : index
      %47 = vector.load %arg10[%c0_37, %c0_38] : memref<8x8xf32, #tpu.memory_space<vmem>>, vector<8x8xf32>
      %48 = vector.broadcast %46 : vector<8x1xf32> to vector<8x8xf32>
      %49 = arith.mulf %47, %48 : vector<8x8xf32>
      %50 = arith.truncf %49 : vector<8x8xf32> to vector<8x8xbf16>
      %c0_39 = arith.constant 0 : index
      %c0_40 = arith.constant 0 : index
      %c0_41 = arith.constant 0 : index
      %c0_42 = arith.constant 0 : index
      %51 = vector.load %arg7[%c0_39, %c0_40, %c0_41, %c0_42] : memref<1x1x8x8xbf16, #tpu.memory_space<vmem>>, vector<1x1x8x8xbf16>
      %52 = vector.shape_cast %51 : vector<1x1x8x8xbf16> to vector<8x8xbf16>
      %53 = vector.shape_cast %50 : vector<8x8xbf16> to vector<1x1x8x8xbf16>
      tpu.vector_store %arg7[%c0_39, %c0_40, %c0_41, %c0_42], %53 {strides = array<i32>} : memref<1x1x8x8xbf16, #tpu.memory_space<vmem>>, vector<1x1x8x8xbf16>,
    } else {
    }
    return
  }
  func.func @transform_0(%arg0: i32, %arg1: i32, %arg2: i32, %arg3: i32) -> (i32, i32, i32, i32) {
    %c0_i32 = arith.constant 0 : i32
    %c0_i32_0 = arith.constant 0 : i32
    return %arg0, %arg1, %arg2, %c0_i32 : i32, i32, i32, i32
  }
  func.func @transform_1(%arg0: i32, %arg1: i32, %arg2: i32, %arg3: i32) -> (i32, i32, i32, i32, i32) {
    %c0_i32 = arith.constant 0 : i32
    %c0_i32_0 = arith.constant 0 : i32
    %c0_i32_1 = arith.constant 0 : i32
    return %c0_i32, %arg0, %arg1, %arg3, %c0_i32_0 : i32, i32, i32, i32, i32
  }
  func.func @transform_2(%arg0: i32, %arg1: i32, %arg2: i32, %arg3: i32) -> (i32, i32, i32, i32) {
    %c0_i32 = arith.constant 0 : i32
    %c0_i32_0 = arith.constant 0 : i32
    return %arg0, %c0_i32, %arg2, %arg3 : i32, i32, i32, i32
  }
  func.func @transform_3(%arg0: i32, %arg1: i32, %arg2: i32, %arg3: i32) -> (i32, i32, i32, i32) {
    %c0_i32 = arith.constant 0 : i32
    %c0_i32_0 = arith.constant 0 : i32
    return %arg0, %arg1, %arg2, %c0_i32 : i32, i32, i32, i32
  }
}

module attributes {stable_mosaic.version = 11 : i64} {
  func.func @_gated_highway_kernel(%arg0: i32, %arg1: i32, %arg2: memref<16x32xbf16, #tpu.memory_space<vmem>>, %arg3: memref<32x32xbf16, #tpu.memory_space<vmem>>, %arg4: memref<1x32xbf16, #tpu.memory_space<vmem>>, %arg5: memref<32x32xbf16, #tpu.memory_space<vmem>>, %arg6: memref<16x32xbf16, #tpu.memory_space<vmem>>) attributes {dimension_semantics = [#tpu.dimension_semantics<parallel>, #tpu.dimension_semantics<parallel>], iteration_bounds = array<i64: 1, 1>, scalar_prefetch = 0 : i64, scratch_operands = 0 : i64, tpu.core_type = #tpu.core_type<tc>, window_params = [{transform_indices = @transform_0, window_bounds = array<i64: 16, 32>}, {transform_indices = @transform_1, window_bounds = array<i64: 32, 32>}, {transform_indices = @transform_2, window_bounds = array<i64: 1, 32>}, {transform_indices = @transform_3, window_bounds = array<i64: 32, 32>}, {transform_indices = @transform_4, window_bounds = array<i64: 16, 32>}]} {
    %c0 = arith.constant 0 : index
    %c0_0 = arith.constant 0 : index
    %0 = vector.load %arg2[%c0, %c0_0] : memref<16x32xbf16, #tpu.memory_space<vmem>>, vector<16x32xbf16>
    %c0_1 = arith.constant 0 : index
    %c0_2 = arith.constant 0 : index
    %1 = vector.load %arg3[%c0_1, %c0_2] : memref<32x32xbf16, #tpu.memory_space<vmem>>, vector<32x32xbf16>
    %cst = arith.constant dense<0.000000e+00> : vector<16x32xf32>
    %2 = tpu.matmul %0, %1, %cst {dimension_numbers = #tpu.dot_dimension_numbers<[1], [0], [0], [1], [0, 0, 1, 1], [], []>} : vector<16x32xbf16>, vector<32x32xbf16>, vector<16x32xf32> -> vector<16x32xf32>
    %c0_3 = arith.constant 0 : index
    %c0_4 = arith.constant 0 : index
    %3 = vector.load %arg4[%c0_3, %c0_4] : memref<1x32xbf16, #tpu.memory_space<vmem>>, vector<1x32xbf16>
    %4 = arith.extf %3 : vector<1x32xbf16> to vector<1x32xf32>
    %5 = vector.broadcast %4 : vector<1x32xf32> to vector<16x32xf32>
    %6 = arith.addf %2, %5 : vector<16x32xf32>
    %c0_5 = arith.constant 0 : index
    %c0_6 = arith.constant 0 : index
    %7 = vector.load %arg5[%c0_5, %c0_6] : memref<32x32xbf16, #tpu.memory_space<vmem>>, vector<32x32xbf16>
    %cst_7 = arith.constant dense<0.000000e+00> : vector<16x32xf32>
    %8 = tpu.matmul %0, %7, %cst_7 {dimension_numbers = #tpu.dot_dimension_numbers<[1], [0], [0], [1], [0, 0, 1, 1], [], []>} : vector<16x32xbf16>, vector<32x32xbf16>, vector<16x32xf32> -> vector<16x32xf32>
    %9 = arith.negf %6 : vector<16x32xf32>
    %10 = math.exp %9 : vector<16x32xf32>
    %cst_8 = arith.constant 1.000000e+00 : f32
    %11 = vector.broadcast %cst_8 : f32 to vector<16x32xf32>
    %12 = arith.addf %11, %10 : vector<16x32xf32>
    %13 = arith.divf %11, %12 : vector<16x32xf32>
    %14 = arith.mulf %13, %8 : vector<16x32xf32>
    %15 = arith.truncf %14 : vector<16x32xf32> to vector<16x32xbf16>
    %c0_9 = arith.constant 0 : index
    %c0_10 = arith.constant 0 : index
    %16 = vector.load %arg6[%c0_9, %c0_10] : memref<16x32xbf16, #tpu.memory_space<vmem>>, vector<16x32xbf16>
    tpu.vector_store %arg6[%c0_9, %c0_10], %15 {strides = array<i32>} : memref<16x32xbf16, #tpu.memory_space<vmem>>, vector<16x32xbf16>,
    return
  }
  func.func @transform_0(%arg0: i32, %arg1: i32) -> (i32, i32) {
    %c0_i32 = arith.constant 0 : i32
    %c0_i32_0 = arith.constant 0 : i32
    return %arg0, %c0_i32 : i32, i32
  }
  func.func @transform_1(%arg0: i32, %arg1: i32) -> (i32, i32) {
    %c0_i32 = arith.constant 0 : i32
    %c0_i32_0 = arith.constant 0 : i32
    return %c0_i32, %arg1 : i32, i32
  }
  func.func @transform_2(%arg0: i32, %arg1: i32) -> (i32, i32) {
    %c0_i32 = arith.constant 0 : i32
    %c0_i32_0 = arith.constant 0 : i32
    return %c0_i32, %arg1 : i32, i32
  }
  func.func @transform_3(%arg0: i32, %arg1: i32) -> (i32, i32) {
    %c0_i32 = arith.constant 0 : i32
    %c0_i32_0 = arith.constant 0 : i32
    return %c0_i32, %arg1 : i32, i32
  }
  func.func @transform_4(%arg0: i32, %arg1: i32) -> (i32, i32) {
    %c0_i32 = arith.constant 0 : i32
    return %arg0, %arg1 : i32, i32
  }
}

module attributes {stable_mosaic.version = 11 : i64} {
  func.func @_rmsnorm_kernel(%arg0: i32, %arg1: memref<16x32xbf16, #tpu.memory_space<vmem>>, %arg2: memref<1x32xbf16, #tpu.memory_space<vmem>>, %arg3: memref<16x32xbf16, #tpu.memory_space<vmem>>) attributes {dimension_semantics = [#tpu.dimension_semantics<parallel>], iteration_bounds = array<i64: 1>, scalar_prefetch = 0 : i64, scratch_operands = 0 : i64, tpu.core_type = #tpu.core_type<tc>, window_params = [{transform_indices = @transform_0, window_bounds = array<i64: 16, 32>}, {pipeline_mode = #tpu.pipeline_mode<synchronous>, transform_indices = @transform_1, window_bounds = array<i64: 1, 32>}, {transform_indices = @transform_2, window_bounds = array<i64: 16, 32>}]} {
    %c0 = arith.constant 0 : index
    %c0_0 = arith.constant 0 : index
    %0 = vector.load %arg1[%c0, %c0_0] : memref<16x32xbf16, #tpu.memory_space<vmem>>, vector<16x32xbf16>
    %1 = arith.extf %0 : vector<16x32xbf16> to vector<16x32xf32>
    %2 = arith.mulf %1, %1 : vector<16x32xf32>
    %cst = arith.constant dense<0.000000e+00> : vector<16xf32>
    %3 = vector.multi_reduction <add>, %2, %cst [1] : vector<16x32xf32> to vector<16xf32>
    %4 = vector.shape_cast %3 : vector<16xf32> to vector<16x1xf32>
    %cst_1 = arith.constant 3.200000e+01 : f32
    %5 = vector.broadcast %cst_1 : f32 to vector<16x1xf32>
    %6 = arith.divf %4, %5 : vector<16x1xf32>
    %cst_2 = arith.constant 9.99999997E-7 : f32
    %7 = vector.broadcast %cst_2 : f32 to vector<16x1xf32>
    %8 = arith.addf %6, %7 : vector<16x1xf32>
    %9 = math.rsqrt %8 : vector<16x1xf32>
    %10 = vector.broadcast %9 : vector<16x1xf32> to vector<16x32xf32>
    %11 = arith.mulf %1, %10 : vector<16x32xf32>
    %c0_3 = arith.constant 0 : index
    %c0_4 = arith.constant 0 : index
    %12 = vector.load %arg2[%c0_3, %c0_4] : memref<1x32xbf16, #tpu.memory_space<vmem>>, vector<1x32xbf16>
    %13 = arith.extf %12 : vector<1x32xbf16> to vector<1x32xf32>
    %14 = vector.broadcast %13 : vector<1x32xf32> to vector<16x32xf32>
    %15 = arith.mulf %11, %14 : vector<16x32xf32>
    %16 = arith.addf %15, %1 : vector<16x32xf32>
    %17 = arith.truncf %16 : vector<16x32xf32> to vector<16x32xbf16>
    %c0_5 = arith.constant 0 : index
    %c0_6 = arith.constant 0 : index
    %18 = vector.load %arg3[%c0_5, %c0_6] : memref<16x32xbf16, #tpu.memory_space<vmem>>, vector<16x32xbf16>
    tpu.vector_store %arg3[%c0_5, %c0_6], %17 {strides = array<i32>} : memref<16x32xbf16, #tpu.memory_space<vmem>>, vector<16x32xbf16>,
    return
  }
  func.func @transform_0(%arg0: i32) -> (i32, i32) {
    %c0_i32 = arith.constant 0 : i32
    %c0_i32_0 = arith.constant 0 : i32
    return %arg0, %c0_i32 : i32, i32
  }
  func.func @transform_1(%arg0: i32) -> (i32, i32) {
    %c0_i32 = arith.constant 0 : i32
    %c0_i32_0 = arith.constant 0 : i32
    %c0_i32_1 = arith.constant 0 : i32
    return %c0_i32, %c0_i32_0 : i32, i32
  }
  func.func @transform_2(%arg0: i32) -> (i32, i32) {
    %c0_i32 = arith.constant 0 : i32
    %c0_i32_0 = arith.constant 0 : i32
    return %arg0, %c0_i32 : i32, i32
  }
}

module attributes {stable_mosaic.version = 11 : i64} {
  func.func @_rms_linear_kernel(%arg0: i32, %arg1: i32, %arg2: memref<16x32xbf16, #tpu.memory_space<vmem>>, %arg3: memref<1x32xbf16, #tpu.memory_space<vmem>>, %arg4: memref<32x256xbf16, #tpu.memory_space<vmem>>, %arg5: memref<16x256xf32, #tpu.memory_space<vmem>>) attributes {dimension_semantics = [#tpu.dimension_semantics<parallel>, #tpu.dimension_semantics<parallel>], iteration_bounds = array<i64: 1, 1>, scalar_prefetch = 0 : i64, scratch_operands = 0 : i64, tpu.core_type = #tpu.core_type<tc>, window_params = [{transform_indices = @transform_0, window_bounds = array<i64: 16, 32>}, {pipeline_mode = #tpu.pipeline_mode<synchronous>, transform_indices = @transform_1, window_bounds = array<i64: 1, 32>}, {transform_indices = @transform_2, window_bounds = array<i64: 32, 256>}, {transform_indices = @transform_3, window_bounds = array<i64: 16, 256>}]} {
    %c0 = arith.constant 0 : index
    %c0_0 = arith.constant 0 : index
    %0 = vector.load %arg2[%c0, %c0_0] : memref<16x32xbf16, #tpu.memory_space<vmem>>, vector<16x32xbf16>
    %1 = arith.extf %0 : vector<16x32xbf16> to vector<16x32xf32>
    %2 = arith.mulf %1, %1 : vector<16x32xf32>
    %cst = arith.constant dense<0.000000e+00> : vector<16xf32>
    %3 = vector.multi_reduction <add>, %2, %cst [1] : vector<16x32xf32> to vector<16xf32>
    %4 = vector.shape_cast %3 : vector<16xf32> to vector<16x1xf32>
    %cst_1 = arith.constant 3.200000e+01 : f32
    %5 = vector.broadcast %cst_1 : f32 to vector<16x1xf32>
    %6 = arith.divf %4, %5 : vector<16x1xf32>
    %cst_2 = arith.constant 9.99999997E-7 : f32
    %7 = vector.broadcast %cst_2 : f32 to vector<16x1xf32>
    %8 = arith.addf %6, %7 : vector<16x1xf32>
    %9 = math.rsqrt %8 : vector<16x1xf32>
    %10 = vector.broadcast %9 : vector<16x1xf32> to vector<16x32xf32>
    %11 = arith.mulf %1, %10 : vector<16x32xf32>
    %c0_3 = arith.constant 0 : index
    %c0_4 = arith.constant 0 : index
    %12 = vector.load %arg3[%c0_3, %c0_4] : memref<1x32xbf16, #tpu.memory_space<vmem>>, vector<1x32xbf16>
    %13 = arith.extf %12 : vector<1x32xbf16> to vector<1x32xf32>
    %14 = vector.broadcast %13 : vector<1x32xf32> to vector<16x32xf32>
    %15 = arith.mulf %11, %14 : vector<16x32xf32>
    %16 = arith.truncf %15 : vector<16x32xf32> to vector<16x32xbf16>
    %c0_5 = arith.constant 0 : index
    %c0_6 = arith.constant 0 : index
    %17 = vector.load %arg4[%c0_5, %c0_6] : memref<32x256xbf16, #tpu.memory_space<vmem>>, vector<32x256xbf16>
    %cst_7 = arith.constant dense<0.000000e+00> : vector<16x256xf32>
    %18 = tpu.matmul %16, %17, %cst_7 {dimension_numbers = #tpu.dot_dimension_numbers<[1], [0], [0], [1], [0, 0, 1, 1], [], []>} : vector<16x32xbf16>, vector<32x256xbf16>, vector<16x256xf32> -> vector<16x256xf32>
    %c0_8 = arith.constant 0 : index
    %c0_9 = arith.constant 0 : index
    %19 = vector.load %arg5[%c0_8, %c0_9] : memref<16x256xf32, #tpu.memory_space<vmem>>, vector<16x256xf32>
    tpu.vector_store %arg5[%c0_8, %c0_9], %18 {strides = array<i32>} : memref<16x256xf32, #tpu.memory_space<vmem>>, vector<16x256xf32>,
    return
  }
  func.func @transform_0(%arg0: i32, %arg1: i32) -> (i32, i32) {
    %c0_i32 = arith.constant 0 : i32
    %c0_i32_0 = arith.constant 0 : i32
    return %arg0, %c0_i32 : i32, i32
  }
  func.func @transform_1(%arg0: i32, %arg1: i32) -> (i32, i32) {
    %c0_i32 = arith.constant 0 : i32
    %c0_i32_0 = arith.constant 0 : i32
    %c0_i32_1 = arith.constant 0 : i32
    return %c0_i32, %c0_i32_0 : i32, i32
  }
  func.func @transform_2(%arg0: i32, %arg1: i32) -> (i32, i32) {
    %c0_i32 = arith.constant 0 : i32
    %c0_i32_0 = arith.constant 0 : i32
    return %c0_i32, %arg1 : i32, i32
  }
  func.func @transform_3(%arg0: i32, %arg1: i32) -> (i32, i32) {
    %c0_i32 = arith.constant 0 : i32
    return %arg0, %arg1 : i32, i32
  }
}

</mosaic_0001>

<bundles_post_ra>
// kernel: gemma_modular_forward.24
= control target key start
LH: loop header
LB: loop body
LE: loop exit
PB: predicated region body
PF: predicated region fallthrough
CT: control target
= control target key end

     0   :  { %vm21_vm0 = vcmask 261120   ;;  %v151_v7 = vmov 0.0   ;;  %vm152_vm1 = vmmov 0   ;;  %v39_v16 = vlaneseq  ;;  %s194_s0 = inlined_call_operand.vmem [shape: bf16[16,32], index: 0, kind: input, shape index: {}]   ;;  %s195_s2 = inlined_call_operand.vmem [shape: bf16[32,64], index: 2, kind: input, shape index: {}]   ;;  %s196_s1 = inlined_call_operand.vmem [shape: bf16[1,32], index: 1, kind: input, shape index: {}]   ;;  %s197_s3 = inlined_call_operand.vmem [shape: bf16[16,64], index: 3, kind: output, shape index: {}]  }
   0x1   :  { %v129_v0 = vld [vmem:[%s194_s0] sm:$0xff]   ;;  %135 = vmatprep.subr.bf16.mxu0 %v151_v7  ;;  %v145_v8 = vld [vmem:[%s195_s2 + $0x8] sm:$0xff]   ;;  %139 = vmatprep.mubr.msk.bf16.mxu0 %vm152_vm1, %v151_v7  ;;  %vm114_vm2 = vcmask 519168  }
   0x2   :  { %v130_v1 = vunpack.c.l.bf16 %v129_v0  ;;  %v131_v2 = vunpack.c.h.bf16 %v129_v0  ;;  %136 = vmatpush3.bf16.msra.mxu0 %v145_v8  ;;  %v146_v9 = vld [vmem:[%s195_s2] sm:$0xff]   ;;  %v40_v17 = vshrl.u32 %v39_v16, 7 }
   0x3   :  { %137 = vmatprep.subr.bf16.mxu0 %v151_v7  ;;  %v37_v18 = vld [vmem:[%s196_s1] sm:$0x1] }
   0x4   :  { %v19_v3 = vmul.f32 %v130_v1, %v130_v1  ;;  %v20_v4 = vmul.f32 %v131_v2, %v131_v2  ;;  %v38_v19 = vunpack.c.l.bf16 %v37_v18  ;;  %v41_v20 = vsub.s32 0, %v40_v17 }
   0x6   :  { %v22_v5 = vsel %vm21_vm0, %v19_v3, 0.0  ;;  %v25_v6 = vsel %vm21_vm0, %v20_v4, 0.0  ;;  %138 = vmatpush3.bf16.msra.mxu0 %v146_v9  ;;  %v42_v23 = vrot.slane %v38_v19, %v41_v20 }
   0x7   :  { %23 = vadd.xlane.f32.xlu0 %v22_v5 }
   0xb   :  { %26 = vadd.xlane.f32.xlu0 %v25_v6 }
  0x90   :  { %v24_v10 = vpop.xlane.xlu0 %23 }
  0x91   :  { %v29_v11 = vmul.f32 0.03125, %v24_v10 }
  0x93   :  { %v31_v12 = vadd.f32 1e-06, %v29_v11 }
  0x94   :  { %v27_v13 = vpop.xlane.xlu0 %26 }
  0x95   :  { %147 = vrsqrt.f32 %v31_v12  ;;  %v30_v14 = vmul.f32 0.03125, %v27_v13 }
  0x97   :  { %v32_v15 = vadd.f32 1e-06, %v30_v14 }
  0x99   :  { %149 = vrsqrt.f32 %v32_v15 }
  0xa2   :  { %v148_v21 = vpop.eup %147 }
  0xa3   :  { %v35_v22 = vmul.f32 %v148_v21, %v130_v1 }
  0xa5   :  { %v43_v26 = vmul.f32 %v42_v23, %v35_v22 }
  0xa6   :  { %v150_v24 = vpop.eup %149 }
  0xa7   :  { %v36_v25 = vmul.f32 %v150_v24, %v131_v2 }
  0xa9   :  { %v44_v27 = vmul.f32 %v42_v23, %v36_v25 }
  0xab   :  { %v45_v28 = vpack.c.bf16 %v44_v27, %v43_v26 }
  0xad   :  { %140 = vmatmul.mubr.msk.bf16.vlgmr.msra.gmra.mxu0 %vm21_vm0, %v45_v28 }
 0x16d   :  { %v99_v29 = vpop.f32.mrf.mxu0 }
 0x16e   :  { %v126_v30 = vpack.c.bf16 %v99_v29, %v99_v29 }
 0x16f   :  { %v141_v31 = vpop.f32.mrf.mxu0 }
 0x170   :  { %115 = vst.msk [vmem:[%s197_s3] sm:$0xf] %vm114_vm2, %v126_v30 }
 0x171   :  { %v102_v32 = vpop.f32.mrf.mxu0 }
 0x172   :  { %v127_v33 = vpack.c.bf16 %v102_v32, %v102_v32 }
 0x173   :  { %v142_v34 = vpop.f32.mrf.mxu0 }
 0x174   :  { %116 = vst.msk [vmem:[%s197_s3 + $0x4] sm:$0xf] %vm114_vm2, %v127_v33 }

// kernel: gemma_modular_forward.23
= control target key start
LH: loop header
LB: loop body
LE: loop exit
PB: predicated region body
PF: predicated region fallthrough
CT: control target
= control target key end

     0   :  { %vm21_vm0 = vcmask 261120   ;;  %v151_v7 = vmov 0.0   ;;  %vm152_vm1 = vmmov 0   ;;  %v39_v16 = vlaneseq  ;;  %s194_s0 = inlined_call_operand.vmem [shape: bf16[16,32], index: 0, kind: input, shape index: {}]   ;;  %s195_s2 = inlined_call_operand.vmem [shape: bf16[32,32], index: 2, kind: input, shape index: {}]   ;;  %s196_s1 = inlined_call_operand.vmem [shape: bf16[1,32], index: 1, kind: input, shape index: {}]   ;;  %s197_s3 = inlined_call_operand.vmem [shape: bf16[16,32], index: 3, kind: output, shape index: {}]  }
   0x1   :  { %v129_v0 = vld [vmem:[%s194_s0] sm:$0xff]   ;;  %135 = vmatprep.subr.bf16.mxu0 %v151_v7  ;;  %v145_v8 = vld [vmem:[%s195_s2 + $0x8] sm:$0xff]   ;;  %139 = vmatprep.mubr.msk.bf16.mxu0 %vm152_vm1, %v151_v7  ;;  %vm114_vm2 = vcmask 257024  }
   0x2   :  { %v130_v1 = vunpack.c.l.bf16 %v129_v0  ;;  %v131_v2 = vunpack.c.h.bf16 %v129_v0  ;;  %136 = vmatpush3.bf16.msra.mxu0 %v145_v8  ;;  %v146_v9 = vld [vmem:[%s195_s2] sm:$0xff]   ;;  %v40_v17 = vshrl.u32 %v39_v16, 7 }
   0x3   :  { %137 = vmatprep.subr.bf16.mxu0 %v151_v7  ;;  %v37_v18 = vld [vmem:[%s196_s1] sm:$0x1] }
   0x4   :  { %v19_v3 = vmul.f32 %v130_v1, %v130_v1  ;;  %v20_v4 = vmul.f32 %v131_v2, %v131_v2  ;;  %v38_v19 = vunpack.c.l.bf16 %v37_v18  ;;  %v41_v20 = vsub.s32 0, %v40_v17 }
   0x6   :  { %v22_v5 = vsel %vm21_vm0, %v19_v3, 0.0  ;;  %v25_v6 = vsel %vm21_vm0, %v20_v4, 0.0  ;;  %138 = vmatpush3.bf16.msra.mxu0 %v146_v9  ;;  %v42_v23 = vrot.slane %v38_v19, %v41_v20 }
   0x7   :  { %23 = vadd.xlane.f32.xlu0 %v22_v5 }
   0xb   :  { %26 = vadd.xlane.f32.xlu0 %v25_v6 }
  0x90   :  { %v24_v10 = vpop.xlane.xlu0 %23 }
  0x91   :  { %v29_v11 = vmul.f32 0.03125, %v24_v10 }
  0x93   :  { %v31_v12 = vadd.f32 1e-06, %v29_v11 }
  0x94   :  { %v27_v13 = vpop.xlane.xlu0 %26 }
  0x95   :  { %147 = vrsqrt.f32 %v31_v12  ;;  %v30_v14 = vmul.f32 0.03125, %v27_v13 }
  0x97   :  { %v32_v15 = vadd.f32 1e-06, %v30_v14 }
  0x99   :  { %149 = vrsqrt.f32 %v32_v15 }
  0xa2   :  { %v148_v21 = vpop.eup %147 }
  0xa3   :  { %v35_v22 = vmul.f32 %v148_v21, %v130_v1 }
  0xa5   :  { %v43_v26 = vmul.f32 %v42_v23, %v35_v22 }
  0xa6   :  { %v150_v24 = vpop.eup %149 }
  0xa7   :  { %v36_v25 = vmul.f32 %v150_v24, %v131_v2 }
  0xa9   :  { %v44_v27 = vmul.f32 %v42_v23, %v36_v25 }
  0xab   :  { %v45_v28 = vpack.c.bf16 %v44_v27, %v43_v26 }
  0xad   :  { %140 = vmatmul.mubr.msk.bf16.vlgmr.msra.gmra.mxu0 %vm21_vm0, %v45_v28 }
 0x16d   :  { %v99_v29 = vpop.f32.mrf.mxu0 }
 0x16e   :  { %v126_v30 = vpack.c.bf16 %v99_v29, %v99_v29 }
 0x16f   :  { %v141_v31 = vpop.f32.mrf.mxu0 }
 0x170   :  { %115 = vst.msk [vmem:[%s197_s3] sm:$0xf] %vm114_vm2, %v126_v30 }
 0x171   :  { %v102_v32 = vpop.f32.mrf.mxu0 }
 0x172   :  { %v127_v33 = vpack.c.bf16 %v102_v32, %v102_v32 }
 0x173   :  { %v142_v34 = vpop.f32.mrf.mxu0 }
 0x174   :  { %116 = vst.msk [vmem:[%s197_s3 + $0x4] sm:$0xf] %vm114_vm2, %v127_v33 }

// kernel: gemma_modular_forward.25
= control target key start
LH: loop header
LB: loop body
LE: loop exit
PB: predicated region body
PF: predicated region fallthrough
CT: control target
= control target key end

     0   :  { %s1135_s24 = smov 0   ;;  %s1137_s25 = smov 0   ;;  %s1273_s0 = inlined_call_operand.vmem [shape: bf16[2,4,8,8], index: 0, kind: input, shape index: {}]   ;;  %s1274_s1 = inlined_call_operand.vmem [shape: bf16[2,2,4,8,8], index: 1, kind: input, shape index: {}]   ;;  %s1275_s2 = inlined_call_operand.vmem [shape: f32[2,1,8,8], index: 2, kind: input, shape index: {}]   ;;  %s1276_s3 = inlined_call_operand.vmem [shape: f32[8,8], index: 3, kind: input, shape index: {}, may-alias: {3,5}]   ;;  %s1277_s4 = inlined_call_operand.vmem [shape: f32[8,8], index: 4, kind: input, shape index: {}, may-alias: {4,6}]   ;;  %s1278_s5 = inlined_call_operand.vmem [shape: f32[8,8], index: 5, kind: input, shape index: {}, may-alias: {3,5}]   ;;  %s1279_s6 = inlined_call_operand.vmem [shape: f32[8,8], index: 6, kind: input, shape index: {}, may-alias: {4,6}]   ;;  %s1280_s7 = inlined_call_operand.vmem [shape: bf16[2,4,8,8], index: 7, kind: output, shape index: {}]  }
   0x1   :  { %s1139_s26 = smov 0   ;;  %s1141_s27 = smov 0  }
   0x2   :  { %s1143_s28 = smov 0   ;;  %s1145_s29 = smov 0  }
   0x3   :  { %s1147_s30 = smov 0  }
   0x4 LB: > { %s39_s8 = sadd.s32 1, %s1079_s28  ;;  %s43_s9 = sadd.s32 1, %s1083_s29  ;;  %s1087_s30 = sphi %s1147_s30, %s17_s30   ;;  %s1083_s29 = sphi %s1145_s29, %s1286_s29   ;;  %s1079_s28 = sphi %s1143_s28, %s1285_s28   ;;  %s1075_s27 = sphi %s1141_s27, %s1284_s27   ;;  %s1071_s26 = sphi %s1139_s26, %s1283_s26   ;;  %s1067_s25 = sphi %s1137_s25, %s1282_s25   ;;  %s1063_s24 = sphi %s1135_s24, %s1281_s24  }
   0x5   : > { %p41_p0 = scmp.ge.s32.totalorder %s39_s8, 4  ;;  %p91_p1 = scmp.ne.s32.totalorder %s1067_s25, %s1063_s24 }
   0x6   : > { %p92_p2 = scmp.eq.s32.totalorder %s1087_s30, 0  ;;  %s84_s13 = sadd.s32 1, %s1067_s25 }
   0x7   : > { %s1288_s8 = smov (%p41_p0, %s39_s8), 0  ;;  %s1290_s9 = smov (!%p41_p0, %s43_s9), %s1083_s29 }
   0x8   : > { %p93_p3 = por %p92_p2, %p91_p1  ;;  %p45_p4 = scmp.ge.s32.totalorder %s1290_s9, 2 }
   0x9   : > { %s78_s10 = ssub.s32 %s1079_s28, %s1288_s8  ;;  %p931_p6 = scmp.ge.s32.totalorder %s1087_s30, 8 }
   0xa   : > { %s1292_s9 = smov (%p45_p4, %s1290_s9), 0 }
   0xb   : > { %s77_s11 = ssub.s32 %s1083_s29, %s1292_s9  ;;  %309 = sbr.rel (%p931_p6) target bundleno = 24 (0x18), region = 32 }
   0xc   : > { %s79_s12 = sor.u32 %s78_s10, %s77_s11 }
   0xd   : > { %p82_p5 = scmp.eq.s32.totalorder %s79_s12, 0 }
   0xf   : > { %s1186_s14 = scalar_select %p82_p5, %s1067_s25, %s84_s13  }
  0x10   : > { %326 = sbr.rel (!%p93_p3) target bundleno = 24 (0x18), region = 40  ;;  %s328_s15 = sand.u32 (%p93_p3), 1, %s1067_s25  }
  0x11   : > { %s933_s16 = sshll.u32 (%p93_p3), %s1083_s29, 2  ;;  %s932_s17 = sshll.u32 (%p93_p3), %s328_s15, 3 }
  0x12   : > { %s333_s18 = sadd.s32 (%p93_p3), %s1079_s28, %s933_s16  ;;  %s330_s23 = scalar_lea.vmem (%p93_p3), [#allocation5], %s932_s17 }
  0x13   : > { %s934_s19 = sshll.u32 (%p93_p3), %s333_s18, 2 }
  0x14   : > { %s335_s22 = scalar_lea.vmem (%p93_p3), %s1274_s1, %s934_s19 }
  0x15   : > { %v352_v0 = vld [vmem:[%s335_s22] sm:$0xf] }
  0x16   : > { %v354_v1 = vld [vmem:[%s335_s22 + $0x20] sm:$0xf]  ;;  %353 = vst [vmem:[%s330_s23] sm:$0xf] %v352_v0 }
  0x17   : > { %355 = vst [vmem:[%s330_s23 + $0x4] sm:$0xf] %v354_v1 }
  0x18 PF: > { %p935_p7 = scmp.ge.s32.totalorder %s1087_s30, 1  ;;  %p395_p8 = scmp.lt.s32.totalorder %s1087_s30, 9 }
  0x1a   : > { %p396_p9 = pnand %p935_p7, %p395_p8 }
  0x1b   : > { %s402_s10 = sand.u32 (!%p396_p9), 1, %s1063_s24   ;;  %p476_p10 = scmp.lt.s32.totalorder (!%p396_p9), %s1075_s27, 1 }
  0x1c   : > { %399 = sbr.rel (%p396_p9) target bundleno = 942 (0x3ae), region = 85  ;;  %s1198_s11 = sshll.u32 (!%p396_p9), %s402_s10, 3 }
  0x1d   : > { %s404_s12 = scalar_lea.vmem (!%p396_p9), [#allocation5], %s1198_s11  ;;  %p478_p11 = scmp.lt.s32.totalorder (!%p396_p9), %s1071_s26, 3 }
  0x1e   : > { %s1089_s24 = smov (!%p396_p9), 124  }
  0x21   : > { %v536_v2 = vld [vmem:[%s404_s12] sm:$0xf]  ;;  %s1294_s27 = smov (!%p476_p10, %s1075_s27), 1  ;;  %s1296_s26 = smov (!%p478_p11, %s1071_s26), 3  ;;  %vm532_vm0 = vcmask 64512   ;;  %v1090_v5 = vmov 0.0  }
  0x22   : > { %v537_v3 = vunpack.c.l.bf16 %v536_v2  ;;  %s937_s13 = sshll.u32 %s1294_s27, 2  ;;  %951 = vmatprep.subr.bf16.mxu0 %v1090_v5  ;;  %533 = vst.msk [vmem:[#allocation4] sm:$0xff] %vm532_vm0, %v1090_v5  ;;  %957 = vmatprep.subr.bf16.mxu1 %v1090_v5  ;;  %vm1092_vm1 = vmmov 0   ;;  %v556_v10 = vld [vmem:[%s1278_s5] sm:$0xff]  ;;  %vm551_vm2 = vcmask 31744   ;;  %vm529_vm3 = vcmask 7168  }
  0x23   : > { %s1210_s15 = sadd.s32 %s937_s13, %s1296_s26  ;;  %s1091_s26 = smov 4   ;;  %953 = vmatprep.mubr.msk.bf16.mxu0 %vm1092_vm1, %v1090_v5  ;;  %959 = vmatprep.mubr.msk.bf16.mxu1 %vm1092_vm1, %v1090_v5  ;;  %v568_v11 = vld [vmem:[%s1279_s6] sm:$0xff]  ;;  %v1093_v29 = vmov -inf   ;;  %531 = vst.msk [vmem:[#allocation3] sm:$0xff] %vm529_vm3, %v1090_v5  ;;  %v1094_v37 = vmov 0   ;;  %vm657_vm4 = vcmask 1043456  }
  0x24   : > { %v558_v4 = vsub.f32 0.0, %v537_v3  ;;  %s938_s16 = sshll.u32 %s1210_s15, 2  ;;  %v557_v13 = vmul.f32 %v556_v10, %v537_v3  ;;  %v540_v17 = vld [vmem:[%s1276_s3] sm:$0xff]  ;;  %530 = vst.msk [vmem:[#allocation2] sm:$0xff] %vm529_vm3, %v1093_v29  ;;  %s939_s18 = sshll.u32 %s1294_s27, 3  ;;  %1025 = vset.pattern.permute.xlu1 %v1094_v37  ;;  %1026 = vset.pattern.permute.xlu0 %v1094_v37  ;;  %vm717_vm5 = vcmask 60416  }
  0x25   : > { %s486_s19 = scalar_lea.vmem %s1273_s0, %s938_s16  ;;  %v553_v19 = vld [vmem:[%s1277_s4] sm:$0xff]  ;;  %s496_s20 = scalar_lea.vmem %s1275_s2, %s939_s18 }
  0x26   : > { %560 = vrot.lane.b32.xlu0 %v558_v4, %s1089_s24  ;;  %v534_v6 = vld [vmem:[%s486_s19] sm:$0xf]  ;;  %v942_v42 = vld [vmem:[%s404_s12 + $0x4] sm:$0xf]  ;;  %s523_s12 = scalar_lea.vmem %s1280_s7, %s938_s16 }
  0x27   : > { %v535_v7 = vunpack.c.l.bf16 %v534_v6  ;;  %v574_v30 = vld [vmem:[%s496_s20] sm:$0xff]  ;;  %v659_v43 = vsel %vm657_vm4, %v942_v42, 0 }
  0x28   : > { %958 = vmatpush3.bf16.msra.mxu1 %v659_v43 }
  0x29   : > { %v542_v8 = vsub.f32 0.0, %v535_v7  ;;  %v541_v22 = vmul.f32 %v540_v17, %v535_v7  ;;  %v646_v58 = vld [vmem:[#allocation4] sm:$0xff] }
  0x2a   : > { %564 = vrot.lane.b32.xlu0 %v537_v3, %s1091_s26  ;;  %v638_v52 = vld [vmem:[#allocation3] sm:$0xff] }
  0x2b   : > { %544 = vrot.lane.b32.xlu1 %v542_v8, %s1089_s24  ;;  %v622_v38 = vld [vmem:[#allocation2] sm:$0xff] }
  0x2f   : > { %548 = vrot.lane.b32.xlu1 %v535_v7, %s1091_s26 }
  0x98   : > { %v561_v9 = vpop.permute.xlu0 %560 }
  0x9c   : > { %v565_v12 = vpop.permute.xlu0 %564 }
  0x9d   : > { %v567_v14 = vsel %vm551_vm2, %v561_v9, %v565_v12  ;;  %v545_v16 = vpop.permute.xlu1 %544 }
  0x9e   : > { %v569_v15 = vmul.f32 %v568_v11, %v567_v14 }
  0xa0   : > { %v570_v18 = vadd.f32 %v569_v15, %v557_v13 }
  0xa1   : > { %v549_v21 = vpop.permute.xlu1 %548 }
  0xa2   : > { %v573_v20 = vpack.c.bf16 %v570_v18, %v570_v18  ;;  %v552_v23 = vsel %vm551_vm2, %v545_v16, %v549_v21 }
  0xa3   : > { %v554_v25 = vmul.f32 %v553_v19, %v552_v23 }
  0xa4   : > { %v580_v24 = vsel %vm532_vm0, %v573_v20, 0 }
  0xa5   : > { %952 = vmatpush3.bf16.xpose.msra.mxu0 %v580_v24  ;;  %v555_v26 = vadd.f32 %v554_v25, %v541_v22 }
  0xa7   : > { %v571_v27 = vmul.f32 0.35355338, %v555_v26 }
  0xa9   : > { %v572_v28 = vpack.c.bf16 %v571_v27, %v571_v27 }
  0xac   : > { %954 = vmatmul.mubr.msk.bf16.vlgmr.msra.gmra.mxu0 %vm532_vm0, %v572_v28 }
 0x16c   : > { %v616_v31 = vpop.f32.mrf.mxu0 }
 0x16d   : > { %v617_v32 = vadd.f32 %v616_v31, %v574_v30 }
 0x16e   : > { %v955_v33 = vpop.f32.mrf.mxu0 }
 0x16f   : > { %v623_v34 = vsel %vm532_vm0, %v617_v32, -inf }
 0x170   : > { %624 = vmax.xlane.f32.xlu0 %v623_v34  ;;  %v619_v35 = vpop.f32.mrf.mxu0 }
 0x172   : > { %v956_v36 = vpop.f32.mrf.mxu0 }
 0x1f9   : > { %v625_v39 = vpop.xlane.xlu0 %624 }
 0x1fa   : > { %v626_v40 = vmax.f32 %v622_v38, %v625_v39 }
 0x1fc   : > { %v627_v41 = vsub.f32 %v622_v38, %v626_v40  ;;  %703 = vst.msk [vmem:[#allocation2] sm:$0xff] %vm529_vm3, %v626_v40  ;;  %632 = vperm.xlu1 %1025, %v626_v40  }
 0x1fe   : > { %v628_v44 = vmul.f32 1.442695, %v627_v41 }
 0x200   : > { %1027 = vpow2.f32 %v628_v44 }
 0x20d   : > { %v1028_v45 = vpop.eup %1027 }
 0x20e   : > { %649 = vperm.xlu0 %1026, %v1028_v45   ;;  %v639_v53 = vmul.f32 %v1028_v45, %v638_v52 }
 0x277   : > { %v633_v46 = vpop.permute.xlu1 %632 }
 0x278   : > { %v635_v47 = vsub.f32 %v617_v32, %v633_v46 }
 0x27a   : > { %v636_v48 = vmul.f32 1.442695, %v635_v47 }
 0x27c   : > { %1029 = vpow2.f32 %v636_v48 }
 0x289   : > { %v1030_v49 = vpop.eup %1029  ;;  %v650_v59 = vpop.permute.xlu0 %649 }
 0x28a   : > { %v640_v50 = vsel %vm532_vm0, %v1030_v49, 0.0  ;;  %v653_v51 = vpack.c.bf16 %v1030_v49, %v1030_v49  ;;  %v652_v60 = vmul.f32 %v650_v59, %v646_v58 }
 0x28b   : > { %641 = vadd.xlane.f32.xlu1 %v640_v50 }
 0x28c   : > { %960 = vmatmul.mubr.msk.bf16.vlgmr.msra.gmra.mxu1 %vm532_vm0, %v653_v51 }
 0x314   : > { %v642_v54 = vpop.xlane.xlu1 %641 }
 0x315   : > { %v643_v55 = vadd.f32 %v642_v54, %v639_v53 }
 0x317   : > { %645 = vst.msk [vmem:[#allocation3] sm:$0xff] %vm529_vm3, %v643_v55 }
 0x31e   : > { %v707_v56 = vld [vmem:[#allocation3] sm:$0xff] }
 0x31f   : > { %1031 = vrcp.f32 %v707_v56 }
 0x32c   : > { %v1032_v57 = vpop.eup %1031 }
 0x32d   : > { %712 = vperm.xlu1 %1025, %v1032_v57  }
 0x34c   : > { %v695_v61 = vpop.f32.mrf.mxu1 }
 0x34d   : > { %v701_v62 = vadd.f32 %v695_v61, %v652_v60 }
 0x34e   : > { %v961_v63 = vpop.f32.mrf.mxu1 }
 0x34f   : > { %702 = vst.msk [vmem:[#allocation4] sm:$0xff] %vm532_vm0, %v701_v62 }
 0x350   : > { %v698_v0 = vpop.f32.mrf.mxu1 }
 0x352   : > { %v962_v1 = vpop.f32.mrf.mxu1 }
 0x356   : > { %v709_v2 = vld [vmem:[#allocation4] sm:$0xff] }
 0x3a8   : > { %v713_v3 = vpop.permute.xlu1 %712 }
 0x3a9   : > { %v715_v4 = vmul.f32 %v713_v3, %v709_v2 }
 0x3ab   : > { %v716_v5 = vpack.c.bf16 %v715_v4, %v715_v4 }
 0x3ad   : > { %718 = vst.msk [vmem:[%s523_s12] sm:$0xf] %vm717_vm5, %v716_v5 }
 0x3ae PF: > { %s17_s30 = sadd.s32 1, %s1087_s30   ;;  %s1281_s24 = smov %s1067_s25 }
 0x3af   : > { %p14_p12 = scmp.ge.s32.totalorder %s17_s30, 10   ;;  %s1282_s25 = smov %s1186_s14 }
 0x3b0   : > { %s1283_s26 = smov %s1079_s28  ;;  %s1284_s27 = smov %s1083_s29 }
 0x3b1   : > { %s1285_s28 = smov %s1288_s8  ;;  %s1286_s29 = smov %s1292_s9 }
 0x3b2   :  { %16 = sbr.rel (!%p14_p12) target bundleno = 4 (0x4), region = 151 }

// kernel: gemma_modular_forward.26
= control target key start
LH: loop header
LB: loop body
LE: loop exit
PB: predicated region body
PF: predicated region fallthrough
CT: control target
= control target key end

     0   :  { %vm19_vm0 = vcmask 261120   ;;  %v150_v0 = vmov 0.0   ;;  %vm151_vm1 = vmmov 0   ;;  %vm115_vm2 = vcmask 257024   ;;  %s195_s1 = inlined_call_operand.vmem [shape: bf16[32,32], index: 1, kind: input, shape index: {}]   ;;  %s196_s0 = inlined_call_operand.vmem [shape: bf16[16,32], index: 0, kind: input, shape index: {}]   ;;  %s197_s2 = inlined_call_operand.vmem [shape: bf16[16,32], index: 2, kind: input, shape index: {}]   ;;  %s198_s3 = inlined_call_operand.vmem [shape: bf16[16,32], index: 3, kind: output, shape index: {}]  }
   0x1   :  { %137 = vmatprep.subr.bf16.mxu0 %v150_v0  ;;  %v147_v1 = vld [vmem:[%s195_s1 + $0x8] sm:$0xff]   ;;  %141 = vmatprep.mubr.msk.bf16.mxu0 %vm151_vm1, %v150_v0  ;;  %20 = vst.msk [vmem:[#allocation2] sm:$0xff] %vm19_vm0, %v150_v0  ;;  %21 = vst.msk [vmem:[#allocation2 + $0x8] sm:$0xff] %vm19_vm0, %v150_v0  ;;  %v148_v2 = vld [vmem:[%s195_s1] sm:$0xff]  }
   0x2   :  { %138 = vmatpush3.bf16.msra.mxu0 %v147_v1  ;;  %v149_v3 = vld [vmem:[%s196_s0] sm:$0xff]  }
   0x3   :  { %139 = vmatprep.subr.bf16.mxu0 %v150_v0  ;;  %v131_v9 = vld [vmem:[%s197_s2] sm:$0xff]  }
   0x4   :  { %v132_v13 = vunpack.c.l.bf16 %v131_v9  ;;  %v133_v16 = vunpack.c.h.bf16 %v131_v9 }
   0x6   :  { %140 = vmatpush3.bf16.msra.mxu0 %v148_v2 }
   0x8   :  { %v22_v4 = vld [vmem:[#allocation2] sm:$0xff]  ;;  %v23_v8 = vld [vmem:[#allocation2 + $0x8] sm:$0xff] }
   0x9   :  { %142 = vmatmul.mubr.msk.bf16.vlgmr.msra.gmra.mxu0 %vm19_vm0, %v149_v3 }
  0xc9   :  { %v85_v5 = vpop.f32.mrf.mxu0 }
  0xca   :  { %v92_v6 = vadd.f32 %v85_v5, %v22_v4 }
  0xcb   :  { %v143_v7 = vpop.f32.mrf.mxu0 }
  0xcc   :  { %94 = vst.msk [vmem:[#allocation2] sm:$0xff] %vm19_vm0, %v92_v6 }
  0xcd   :  { %v88_v10 = vpop.f32.mrf.mxu0 }
  0xce   :  { %v93_v11 = vadd.f32 %v88_v10, %v23_v8 }
  0xcf   :  { %v144_v12 = vpop.f32.mrf.mxu0 }
  0xd0   :  { %95 = vst.msk [vmem:[#allocation2 + $0x8] sm:$0xff] %vm19_vm0, %v93_v11 }
  0xd3   :  { %v99_v14 = vld [vmem:[#allocation2] sm:$0xff] }
  0xd4   :  { %v105_v15 = vadd.f32 %v132_v13, %v99_v14 }
  0xd6   :  { %v128_v17 = vpack.c.bf16 %v105_v15, %v105_v15 }
  0xd7   :  { %v100_v18 = vld [vmem:[#allocation2 + $0x8] sm:$0xff] }
  0xd8   :  { %116 = vst.msk [vmem:[%s198_s3] sm:$0xf] %vm115_vm2, %v128_v17  ;;  %v106_v19 = vadd.f32 %v133_v16, %v100_v18 }
  0xda   :  { %v129_v20 = vpack.c.bf16 %v106_v19, %v106_v19 }
  0xdc   :  { %117 = vst.msk [vmem:[%s198_s3 + $0x4] sm:$0xf] %vm115_vm2, %v129_v20 }

// kernel: gemma_modular_forward.38
= control target key start
LH: loop header
LB: loop body
LE: loop exit
PB: predicated region body
PF: predicated region fallthrough
CT: control target
= control target key end

     0   :  { %vm21_vm0 = vcmask 261120   ;;  %v151_v7 = vmov 0.0   ;;  %vm152_vm1 = vmmov 0   ;;  %v39_v16 = vlaneseq  ;;  %s194_s0 = inlined_call_operand.vmem [shape: bf16[16,32], index: 0, kind: input, shape index: {}]   ;;  %s195_s2 = inlined_call_operand.vmem [shape: bf16[32,32], index: 2, kind: input, shape index: {}]   ;;  %s196_s1 = inlined_call_operand.vmem [shape: bf16[1,32], index: 1, kind: input, shape index: {}]   ;;  %s197_s3 = inlined_call_operand.vmem [shape: bf16[16,32], index: 3, kind: output, shape index: {}]  }
   0x1   :  { %v129_v0 = vld [vmem:[%s194_s0] sm:$0xff]   ;;  %135 = vmatprep.subr.bf16.mxu0 %v151_v7  ;;  %v145_v8 = vld [vmem:[%s195_s2 + $0x8] sm:$0xff]   ;;  %139 = vmatprep.mubr.msk.bf16.mxu0 %vm152_vm1, %v151_v7  ;;  %vm114_vm2 = vcmask 257024  }
   0x2   :  { %v130_v1 = vunpack.c.l.bf16 %v129_v0  ;;  %v131_v2 = vunpack.c.h.bf16 %v129_v0  ;;  %136 = vmatpush3.bf16.msra.mxu0 %v145_v8  ;;  %v146_v9 = vld [vmem:[%s195_s2] sm:$0xff]   ;;  %v40_v17 = vshrl.u32 %v39_v16, 7 }
   0x3   :  { %137 = vmatprep.subr.bf16.mxu0 %v151_v7  ;;  %v37_v18 = vld [vmem:[%s196_s1] sm:$0x1] }
   0x4   :  { %v19_v3 = vmul.f32 %v130_v1, %v130_v1  ;;  %v20_v4 = vmul.f32 %v131_v2, %v131_v2  ;;  %v38_v19 = vunpack.c.l.bf16 %v37_v18  ;;  %v41_v20 = vsub.s32 0, %v40_v17 }
   0x6   :  { %v22_v5 = vsel %vm21_vm0, %v19_v3, 0.0  ;;  %v25_v6 = vsel %vm21_vm0, %v20_v4, 0.0  ;;  %138 = vmatpush3.bf16.msra.mxu0 %v146_v9  ;;  %v42_v23 = vrot.slane %v38_v19, %v41_v20 }
   0x7   :  { %23 = vadd.xlane.f32.xlu0 %v22_v5 }
   0xb   :  { %26 = vadd.xlane.f32.xlu0 %v25_v6 }
  0x90   :  { %v24_v10 = vpop.xlane.xlu0 %23 }
  0x91   :  { %v29_v11 = vmul.f32 0.03125, %v24_v10 }
  0x93   :  { %v31_v12 = vadd.f32 1e-05, %v29_v11 }
  0x94   :  { %v27_v13 = vpop.xlane.xlu0 %26 }
  0x95   :  { %147 = vrsqrt.f32 %v31_v12  ;;  %v30_v14 = vmul.f32 0.03125, %v27_v13 }
  0x97   :  { %v32_v15 = vadd.f32 1e-05, %v30_v14 }
  0x99   :  { %149 = vrsqrt.f32 %v32_v15 }
  0xa2   :  { %v148_v21 = vpop.eup %147 }
  0xa3   :  { %v35_v22 = vmul.f32 %v148_v21, %v130_v1 }
  0xa5   :  { %v43_v26 = vmul.f32 %v42_v23, %v35_v22 }
  0xa6   :  { %v150_v24 = vpop.eup %149 }
  0xa7   :  { %v36_v25 = vmul.f32 %v150_v24, %v131_v2 }
  0xa9   :  { %v44_v27 = vmul.f32 %v42_v23, %v36_v25 }
  0xab   :  { %v45_v28 = vpack.c.bf16 %v44_v27, %v43_v26 }
  0xad   :  { %140 = vmatmul.mubr.msk.bf16.vlgmr.msra.gmra.mxu0 %vm21_vm0, %v45_v28 }
 0x16d   :  { %v99_v29 = vpop.f32.mrf.mxu0 }
 0x16e   :  { %v126_v30 = vpack.c.bf16 %v99_v29, %v99_v29 }
 0x16f   :  { %v141_v31 = vpop.f32.mrf.mxu0 }
 0x170   :  { %115 = vst.msk [vmem:[%s197_s3] sm:$0xf] %vm114_vm2, %v126_v30 }
 0x171   :  { %v102_v32 = vpop.f32.mrf.mxu0 }
 0x172   :  { %v127_v33 = vpack.c.bf16 %v102_v32, %v102_v32 }
 0x173   :  { %v142_v34 = vpop.f32.mrf.mxu0 }
 0x174   :  { %116 = vst.msk [vmem:[%s197_s3 + $0x4] sm:$0xf] %vm114_vm2, %v127_v33 }

// kernel: gemma_modular_forward.27
= control target key start
LH: loop header
LB: loop body
LE: loop exit
PB: predicated region body
PF: predicated region fallthrough
CT: control target
= control target key end

     0   :  { %vm31_vm0 = vcmask 261120   ;;  %v409_v8 = vmov 0.0   ;;  %vm410_vm1 = vmmov 0   ;;  %v49_v14 = vlaneseq  ;;  %s504_s0 = inlined_call_operand.vmem [shape: bf16[16,32], index: 0, kind: input, shape index: {}]   ;;  %s505_s2 = inlined_call_operand.vmem [shape: bf16[32,64], index: 2, kind: input, shape index: {}]   ;;  %s506_s3 = inlined_call_operand.vmem [shape: bf16[32,64], index: 3, kind: input, shape index: {}]   ;;  %s507_s1 = inlined_call_operand.vmem [shape: bf16[1,32], index: 1, kind: input, shape index: {}]   ;;  %s508_s4 = inlined_call_operand.vmem [shape: bf16[64,32], index: 4, kind: input, shape index: {}]   ;;  %s509_s5 = inlined_call_operand.vmem [shape: bf16[16,32], index: 5, kind: output, shape index: {}]  }
   0x1   :  { %v344_v0 = vld [vmem:[%s504_s0] sm:$0xff]   ;;  %v392_v7 = vld [vmem:[%s505_s2 + $0x8] sm:$0xff]   ;;  %362 = vmatprep.subr.bf16.mxu1 %v409_v8  ;;  %66 = vst.msk [vmem:[#allocation3] sm:$0xff] %vm31_vm0, %v409_v8  ;;  %67 = vst.msk [vmem:[#allocation3 + $0x8] sm:$0xff] %vm31_vm0, %v409_v8  ;;  %378 = vmatprep.subr.bf16.mxu0 %v409_v8  ;;  %vm63_vm2 = vcmask 257024   ;;  %vm248_vm3 = vcmask 523264  }
   0x2   :  { %v444_v1 = vunpack.c.l.bf16 %v344_v0  ;;  %v446_v2 = vunpack.c.h.bf16 %v344_v0  ;;  %363 = vmatpush3.bf16.msra.mxu1 %v392_v7  ;;  %v393_v9 = vld [vmem:[%s505_s2] sm:$0xff]   ;;  %366 = vmatprep.mubr.msk.bf16.mxu1 %vm410_vm1, %v409_v8  ;;  %v50_v17 = vshrl.u32 %v49_v14, 7  ;;  %v395_v30 = vld [vmem:[%s506_s3 + $0x8] sm:$0xff]   ;;  %v397_v33 = vld [vmem:[%s508_s4 + $0x18] sm:$0xff]  }
   0x3   :  { %364 = vmatprep.subr.bf16.mxu1 %v409_v8  ;;  %386 = vmatprep.mubr.msk.bf16.mxu0 %vm410_vm1, %v409_v8  ;;  %v47_v18 = vld [vmem:[%s507_s1] sm:$0x1]  ;;  %v398_v34 = vld [vmem:[%s508_s4 + $0x10] sm:$0xff]   ;;  %v399_v35 = vld [vmem:[%s508_s4 + $0x8] sm:$0xff]  }
   0x4   :  { %v29_v3 = vmul.f32 %v444_v1, %v444_v1  ;;  %v30_v4 = vmul.f32 %v446_v2, %v446_v2  ;;  %v48_v19 = vunpack.c.l.bf16 %v47_v18  ;;  %v51_v20 = vsub.s32 0, %v50_v17  ;;  %v396_v32 = vld [vmem:[%s506_s3] sm:$0xff]   ;;  %379 = vmatpush3.bf16.msra.mxu0 %v397_v33 }
   0x5   :  { %380 = vmatprep.subr.bf16.mxu0 %v409_v8  ;;  %v400_v36 = vld [vmem:[%s508_s4] sm:$0xff]  }
   0x6   :  { %v32_v5 = vsel %vm31_vm0, %v29_v3, 0.0  ;;  %v35_v6 = vsel %vm31_vm0, %v30_v4, 0.0  ;;  %365 = vmatpush3.bf16.msra.mxu1 %v393_v9  ;;  %v52_v21 = vrot.slane %v48_v19, %v51_v20 }
   0x7   :  { %33 = vadd.xlane.f32.xlu0 %v32_v5  ;;  %370 = vmatprep.subr.bf16.mxu1 %v409_v8 }
   0x8   :  { %381 = vmatpush3.bf16.msra.mxu0 %v398_v34  ;;  %v213_v4 = vld [vmem:[#allocation3] sm:$0xff] }
   0x9   :  { %382 = vmatprep.subr.bf16.mxu0 %v409_v8 }
   0xb   :  { %36 = vadd.xlane.f32.xlu0 %v35_v6 }
   0xc   :  { %383 = vmatpush3.bf16.msra.mxu0 %v399_v35 }
   0xd   :  { %384 = vmatprep.subr.bf16.mxu0 %v409_v8 }
  0x10   :  { %385 = vmatpush3.bf16.msra.mxu0 %v400_v36 }
  0x90   :  { %v34_v10 = vpop.xlane.xlu0 %33 }
  0x91   :  { %v39_v11 = vmul.f32 0.03125, %v34_v10 }
  0x93   :  { %v41_v12 = vadd.f32 1e-06, %v39_v11 }
  0x94   :  { %v37_v13 = vpop.xlane.xlu0 %36 }
  0x95   :  { %401 = vrsqrt.f32 %v41_v12  ;;  %v40_v15 = vmul.f32 0.03125, %v37_v13 }
  0x97   :  { %v42_v16 = vadd.f32 1e-06, %v40_v15 }
  0x99   :  { %403 = vrsqrt.f32 %v42_v16 }
  0xa2   :  { %v402_v22 = vpop.eup %401 }
  0xa3   :  { %v45_v23 = vmul.f32 %v402_v22, %v444_v1 }
  0xa5   :  { %v53_v24 = vmul.f32 %v52_v21, %v45_v23 }
  0xa6   :  { %v404_v25 = vpop.eup %403 }
  0xa7   :  { %v339_v26 = vpack.c.bf16 %v53_v24, %v53_v24  ;;  %v46_v27 = vmul.f32 %v404_v25, %v446_v2 }
  0xa9   :  { %64 = vst.msk [vmem:[#allocation2] sm:$0xf] %vm63_vm2, %v339_v26  ;;  %v54_v28 = vmul.f32 %v52_v21, %v46_v27 }
  0xab   :  { %v340_v29 = vpack.c.bf16 %v54_v28, %v54_v28 }
  0xad   :  { %65 = vst.msk [vmem:[#allocation2 + $0x4] sm:$0xf] %vm63_vm2, %v340_v29 }
  0xb4   :  { %v394_v31 = vld [vmem:[#allocation2] sm:$0xff]  }
  0xb5   :  { %367 = vmatmul.mubr.msk.bf16.vlgmr.msra.gmra.mxu1 %vm31_vm0, %v394_v31 }
  0xb6   :  { %371 = vmatpush3.bf16.msra.mxu1 %v395_v30  ;;  %374 = vmatprep.mubr.msk.bf16.mxu1 %vm410_vm1, %v409_v8 }
  0xb7   :  { %372 = vmatprep.subr.bf16.mxu1 %v409_v8  ;;  %v214_v8 = vld [vmem:[#allocation3 + $0x8] sm:$0xff] }
  0xba   :  { %373 = vmatpush3.bf16.msra.mxu1 %v396_v32 }
  0xbd   :  { %375 = vmatmul.mubr.msk.bf16.vlgmr.msra.gmra.mxu1 %vm31_vm0, %v394_v31 }
 0x175   :  { %v129_v37 = vpop.f32.mrf.mxu1 }
 0x176   :  { %v193_v38 = vmul.f32 %v129_v37, %v129_v37 }
 0x177   :  { %v368_v39 = vpop.f32.mrf.mxu1 }
 0x178   :  { %v195_v40 = vmul.f32 %v193_v38, %v129_v37 }
 0x179   :  { %v132_v41 = vpop.f32.mrf.mxu1 }
 0x17a   :  { %v197_v42 = vmul.f32 0.044715, %v195_v40  ;;  %v194_v43 = vmul.f32 %v132_v41, %v132_v41 }
 0x17b   :  { %v369_v44 = vpop.f32.mrf.mxu1 }
 0x17c   :  { %v199_v45 = vadd.f32 %v197_v42, %v129_v37  ;;  %v196_v46 = vmul.f32 %v194_v43, %v132_v41 }
 0x17d   :  { %v186_v47 = vpop.f32.mrf.mxu1 }
 0x17e   :  { %v201_v48 = vmul.f32 0.7978846, %v199_v45  ;;  %v198_v49 = vmul.f32 0.044715, %v196_v46 }
 0x17f   :  { %v376_v50 = vpop.f32.mrf.mxu1 }
 0x180   :  { %405 = vtanh.f32 %v201_v48  ;;  %v200_v51 = vadd.f32 %v198_v49, %v132_v41 }
 0x181   :  { %v189_v52 = vpop.f32.mrf.mxu1 }
 0x182   :  { %v202_v53 = vmul.f32 0.7978846, %v200_v51 }
 0x183   :  { %v377_v54 = vpop.f32.mrf.mxu1 }
 0x184   :  { %407 = vtanh.f32 %v202_v53 }
 0x18d   :  { %v406_v55 = vpop.eup %405 }
 0x18e   :  { %v205_v56 = vadd.f32 1.0, %v406_v55 }
 0x190   :  { %v207_v57 = vmul.f32 0.5, %v205_v56 }
 0x191   :  { %v408_v58 = vpop.eup %407 }
 0x192   :  { %v206_v59 = vadd.f32 1.0, %v408_v58  ;;  %v209_v60 = vmul.f32 %v207_v57, %v129_v37 }
 0x194   :  { %v208_v61 = vmul.f32 0.5, %v206_v59  ;;  %v211_v63 = vmul.f32 %v209_v60, %v186_v47 }
 0x196   :  { %v210_v62 = vmul.f32 %v208_v61, %v132_v41 }
 0x198   :  { %v212_v0 = vmul.f32 %v210_v62, %v189_v52 }
 0x19a   :  { %v215_v3 = vpack.c.bf16 %v212_v0, %v211_v63 }
 0x19c   :  { %387 = vmatmul.mubr.msk.bf16.vlgmr.msra.gmra.mxu0 %vm248_vm3, %v215_v3 }
 0x25c   :  { %v286_v5 = vpop.f32.mrf.mxu0 }
 0x25d   :  { %v293_v6 = vadd.f32 %v286_v5, %v213_v4 }
 0x25e   :  { %v388_v7 = vpop.f32.mrf.mxu0 }
 0x25f   :  { %295 = vst.msk [vmem:[#allocation3] sm:$0xff] %vm31_vm0, %v293_v6 }
 0x260   :  { %v289_v9 = vpop.f32.mrf.mxu0 }
 0x261   :  { %v294_v10 = vadd.f32 %v289_v9, %v214_v8 }
 0x262   :  { %v389_v11 = vpop.f32.mrf.mxu0 }
 0x263   :  { %296 = vst.msk [vmem:[#allocation3 + $0x8] sm:$0xff] %vm31_vm0, %v294_v10 }
 0x266   :  { %v304_v12 = vld [vmem:[#allocation3] sm:$0xff] }
 0x267   :  { %v306_v13 = vadd.f32 %v444_v1, %v304_v12 }
 0x269   :  { %v341_v14 = vpack.c.bf16 %v306_v13, %v306_v13 }
 0x26a   :  { %v305_v15 = vld [vmem:[#allocation3 + $0x8] sm:$0xff] }
 0x26b   :  { %317 = vst.msk [vmem:[%s509_s5] sm:$0xf] %vm63_vm2, %v341_v14  ;;  %v307_v16 = vadd.f32 %v446_v2, %v305_v15 }
 0x26d   :  { %v342_v17 = vpack.c.bf16 %v307_v16, %v307_v16 }
 0x26f   :  { %318 = vst.msk [vmem:[%s509_s5 + $0x4] sm:$0xf] %vm63_vm2, %v342_v17 }

// kernel: gemma_modular_forward.39
= control target key start
LH: loop header
LB: loop body
LE: loop exit
PB: predicated region body
PF: predicated region fallthrough
CT: control target
= control target key end

     0   :  { %vm16_vm0 = vcmask 523264   ;;  %v138_v0 = vmov 0.0   ;;  %vm139_vm1 = vmmov 0   ;;  %vm44_vm2 = vcmask 261120   ;;  %s174_s1 = inlined_call_operand.vmem [shape: bf16[32,64], index: 1, kind: input, shape index: {}]   ;;  %s175_s0 = inlined_call_operand.vmem [shape: bf16[16,32], index: 0, kind: input, shape index: {}]   ;;  %s176_s2 = inlined_call_operand.vmem [shape: bf16[16,64], index: 2, kind: output, shape index: {}]  }
   0x1   :  { %125 = vmatprep.subr.bf16.mxu0 %v138_v0  ;;  %v135_v1 = vld [vmem:[%s174_s1 + $0x8] sm:$0xff]   ;;  %129 = vmatprep.mubr.msk.bf16.mxu0 %vm139_vm1, %v138_v0  ;;  %17 = vst.msk [vmem:[#allocation2] sm:$0xff] %vm16_vm0, %v138_v0  ;;  %18 = vst.msk [vmem:[#allocation2 + $0x8] sm:$0xff] %vm16_vm0, %v138_v0  ;;  %v136_v2 = vld [vmem:[%s174_s1] sm:$0xff]   ;;  %vm107_vm3 = vcmask 519168  }
   0x2   :  { %126 = vmatpush3.bf16.msra.mxu0 %v135_v1  ;;  %v137_v3 = vld [vmem:[%s175_s0] sm:$0xff]  }
   0x3   :  { %127 = vmatprep.subr.bf16.mxu0 %v138_v0 }
   0x6   :  { %128 = vmatpush3.bf16.msra.mxu0 %v136_v2 }
   0x8   :  { %v19_v4 = vld [vmem:[#allocation2] sm:$0xff]  ;;  %v20_v8 = vld [vmem:[#allocation2 + $0x8] sm:$0xff] }
   0x9   :  { %130 = vmatmul.mubr.msk.bf16.vlgmr.msra.gmra.mxu0 %vm44_vm2, %v137_v3 }
  0xc9   :  { %v82_v5 = vpop.f32.mrf.mxu0 }
  0xca   :  { %v89_v6 = vadd.f32 %v82_v5, %v19_v4 }
  0xcb   :  { %v131_v7 = vpop.f32.mrf.mxu0 }
  0xcc   :  { %92 = vst.msk [vmem:[#allocation2] sm:$0xff] %vm16_vm0, %v89_v6 }
  0xcd   :  { %v85_v9 = vpop.f32.mrf.mxu0 }
  0xce   :  { %v90_v10 = vadd.f32 %v85_v9, %v20_v8 }
  0xcf   :  { %v132_v11 = vpop.f32.mrf.mxu0 }
  0xd0   :  { %93 = vst.msk [vmem:[#allocation2 + $0x8] sm:$0xff] %vm16_vm0, %v90_v10 }
  0xd3   :  { %v97_v12 = vld [vmem:[#allocation2] sm:$0xff] }
  0xd4   :  { %v120_v13 = vpack.c.bf16 %v97_v12, %v97_v12 }
  0xd6   :  { %108 = vst.msk [vmem:[%s176_s2] sm:$0xf] %vm107_vm3, %v120_v13 }
  0xd7   :  { %v98_v14 = vld [vmem:[#allocation2 + $0x8] sm:$0xff] }
  0xd8   :  { %v121_v15 = vpack.c.bf16 %v98_v14, %v98_v14 }
  0xda   :  { %109 = vst.msk [vmem:[%s176_s2 + $0x4] sm:$0xf] %vm107_vm3, %v121_v15 }

// kernel: gemma_modular_forward.40
= control target key start
LH: loop header
LB: loop body
LE: loop exit
PB: predicated region body
PF: predicated region fallthrough
CT: control target
= control target key end

     0   :  { %s837_s12 = smov 0   ;;  %s839_s13 = smov 0   ;;  %s959_s0 = inlined_call_operand.vmem [shape: bf16[2,4,8,8], index: 0, kind: input, shape index: {}]   ;;  %s960_s1 = inlined_call_operand.vmem [shape: bf16[2,2,4,8,8], index: 1, kind: input, shape index: {}]   ;;  %s961_s2 = inlined_call_operand.vmem [shape: f32[2,1,8,8], index: 2, kind: input, shape index: {}]   ;;  %s962_s3 = inlined_call_operand.vmem [shape: bf16[2,4,8,8], index: 3, kind: output, shape index: {}]  }
   0x1   :  { %s841_s14 = smov 0   ;;  %s843_s15 = smov 0  }
   0x2   :  { %s845_s16 = smov 0   ;;  %s847_s17 = smov 0  }
   0x3   :  { %s849_s18 = smov 0  }
   0x4 LB: > { %s35_s19 = sadd.s32 1, %s803_s16  ;;  %s39_s20 = sadd.s32 1, %s807_s17  ;;  %s811_s18 = sphi %s849_s18, %s13_s18   ;;  %s807_s17 = sphi %s847_s17, %s968_s17   ;;  %s803_s16 = sphi %s845_s16, %s967_s16   ;;  %s799_s15 = sphi %s843_s15, %s966_s15   ;;  %s795_s14 = sphi %s841_s14, %s965_s14   ;;  %s791_s13 = sphi %s839_s13, %s964_s13   ;;  %s787_s12 = sphi %s837_s12, %s963_s12  }
   0x5   : > { %p37_p0 = scmp.ge.s32.totalorder %s35_s19, 4  ;;  %p87_p1 = scmp.ne.s32.totalorder %s791_s13, %s787_s12 }
   0x6   : > { %p88_p2 = scmp.eq.s32.totalorder %s811_s18, 0  ;;  %s80_s24 = sadd.s32 1, %s791_s13 }
   0x7   : > { %s970_s19 = smov (%p37_p0, %s35_s19), 0  ;;  %s972_s20 = smov (!%p37_p0, %s39_s20), %s807_s17 }
   0x8   : > { %p89_p3 = por %p88_p2, %p87_p1  ;;  %p41_p4 = scmp.ge.s32.totalorder %s972_s20, 2 }
   0x9   : > { %s74_s21 = ssub.s32 %s803_s16, %s970_s19  ;;  %p657_p6 = scmp.ge.s32.totalorder %s811_s18, 8 }
   0xa   : > { %s974_s20 = smov (%p41_p4, %s972_s20), 0 }
   0xb   : > { %s73_s22 = ssub.s32 %s807_s17, %s974_s20  ;;  %173 = sbr.rel (%p657_p6) target bundleno = 24 (0x18), region = 16 }
   0xc   : > { %s75_s23 = sor.u32 %s74_s21, %s73_s22 }
   0xd   : > { %p78_p5 = scmp.eq.s32.totalorder %s75_s23, 0 }
   0xf   : > { %s888_s25 = scalar_select %p78_p5, %s791_s13, %s80_s24  }
  0x10   : > { %190 = sbr.rel (!%p89_p3) target bundleno = 24 (0x18), region = 24  ;;  %s192_s26 = sand.u32 (%p89_p3), 1, %s791_s13  }
  0x11   : > { %s659_s27 = sshll.u32 (%p89_p3), %s807_s17, 2  ;;  %s658_s28 = sshll.u32 (%p89_p3), %s192_s26, 3 }
  0x12   : > { %s197_s29 = sadd.s32 (%p89_p3), %s803_s16, %s659_s27  ;;  %s194_s7 = scalar_lea.vmem (%p89_p3), [#allocation5], %s658_s28 }
  0x13   : > { %s660_s30 = sshll.u32 (%p89_p3), %s197_s29, 2 }
  0x14   : > { %s199_s6 = scalar_lea.vmem (%p89_p3), %s960_s1, %s660_s30 }
  0x15   : > { %v216_v0 = vld [vmem:[%s199_s6] sm:$0xf] }
  0x16   : > { %v218_v1 = vld [vmem:[%s199_s6 + $0x20] sm:$0xf]  ;;  %217 = vst [vmem:[%s194_s7] sm:$0xf] %v216_v0 }
  0x17   : > { %219 = vst [vmem:[%s194_s7 + $0x4] sm:$0xf] %v218_v1 }
  0x18 PF: > { %p661_p7 = scmp.ge.s32.totalorder %s811_s18, 1  ;;  %p259_p8 = scmp.lt.s32.totalorder %s811_s18, 9 }
  0x1a   : > { %p260_p9 = pnand %p661_p7, %p259_p8 }
  0x1b   : > { %s266_s8 = sand.u32 (!%p260_p9), 1, %s787_s12   ;;  %p316_p10 = scmp.lt.s32.totalorder (!%p260_p9), %s799_s15, 1 }
  0x1c   : > { %263 = sbr.rel (%p260_p9) target bundleno = 815 (0x32f), region = 69  ;;  %s901_s9 = sshll.u32 (!%p260_p9), %s266_s8, 3 }
  0x1d   : > { %p318_p11 = scmp.lt.s32.totalorder (!%p260_p9), %s795_s14, 3  ;;  %s268_s10 = scalar_lea.vmem (!%p260_p9), [#allocation5], %s901_s9 }
  0x21   : > { %vm356_vm0 = vcmask 64512   ;;  %v813_v2 = vmov 0.0   ;;  %vm814_vm1 = vmmov 0   ;;  %v360_v3 = vld [vmem:[%s268_s10] sm:$0xf]  ;;  %s976_s15 = smov (!%p316_p10, %s799_s15), 1 }
  0x22   : > { %677 = vmatprep.subr.bf16.mxu0 %v813_v2  ;;  %357 = vst.msk [vmem:[#allocation4] sm:$0xff] %vm356_vm0, %v813_v2  ;;  %679 = vmatprep.mubr.msk.bf16.mxu0 %vm814_vm1, %v813_v2  ;;  %v371_v4 = vsel %vm356_vm0, %v360_v3, 0  ;;  %s978_s14 = smov (!%p318_p11, %s795_s14), 3  ;;  %s663_s11 = sshll.u32 %s976_s15, 2  ;;  %vm353_vm2 = vcmask 7168   ;;  %v815_v9 = vmov -inf  }
  0x23   : > { %683 = vmatprep.subr.bf16.mxu1 %v813_v2  ;;  %685 = vmatprep.mubr.msk.bf16.mxu1 %vm814_vm1, %v813_v2  ;;  %s911_s12 = sadd.s32 %s663_s11, %s978_s14  ;;  %354 = vst.msk [vmem:[#allocation2] sm:$0xff] %vm353_vm2, %v815_v9  ;;  %355 = vst.msk [vmem:[#allocation3] sm:$0xff] %vm353_vm2, %v813_v2  ;;  %s665_s14 = sshll.u32 %s976_s15, 3  ;;  %v816_v17 = vmov 0   ;;  %v668_v22 = vld [vmem:[%s268_s10 + $0x4] sm:$0xf] }
  0x24   : > { %678 = vmatpush3.bf16.xpose.msra.mxu0 %v371_v4  ;;  %s664_s21 = sshll.u32 %s911_s12, 2  ;;  %s336_s28 = scalar_lea.vmem %s961_s2, %s665_s14  ;;  %749 = vset.pattern.permute.xlu0 %v816_v17  ;;  %vm448_vm3 = vcmask 1043456   ;;  %vm508_vm4 = vcmask 60416  }
  0x25   : > { %s326_s24 = scalar_lea.vmem %s959_s0, %s664_s21  ;;  %v365_v10 = vld [vmem:[%s336_s28] sm:$0xff]  ;;  %750 = vset.pattern.permute.xlu1 %v816_v17  ;;  %v450_v23 = vsel %vm448_vm3, %v668_v22, 0  ;;  %s347_s30 = scalar_lea.vmem %s962_s3, %s664_s21 }
  0x26   : > { %v358_v5 = vld [vmem:[%s326_s24] sm:$0xf]  ;;  %684 = vmatpush3.bf16.msra.mxu1 %v450_v23 }
  0x27   : > { %v359_v6 = vunpack.c.l.bf16 %v358_v5 }
  0x29   : > { %v363_v7 = vmul.f32 0.35355338, %v359_v6  ;;  %v437_v38 = vld [vmem:[#allocation4] sm:$0xff] }
  0x2a   : > { %v413_v18 = vld [vmem:[#allocation2] sm:$0xff]  ;;  %v429_v32 = vld [vmem:[#allocation3] sm:$0xff] }
  0x2b   : > { %v364_v8 = vpack.c.bf16 %v363_v7, %v363_v7 }
  0x2d   : > { %680 = vmatmul.mubr.msk.bf16.vlgmr.msra.gmra.mxu0 %vm356_vm0, %v364_v8 }
  0xed   : > { %v407_v11 = vpop.f32.mrf.mxu0 }
  0xee   : > { %v408_v12 = vadd.f32 %v407_v11, %v365_v10 }
  0xef   : > { %v681_v13 = vpop.f32.mrf.mxu0 }
  0xf0   : > { %v414_v14 = vsel %vm356_vm0, %v408_v12, -inf }
  0xf1   : > { %415 = vmax.xlane.f32.xlu0 %v414_v14  ;;  %v410_v15 = vpop.f32.mrf.mxu0 }
  0xf3   : > { %v682_v16 = vpop.f32.mrf.mxu0 }
 0x17a   : > { %v416_v19 = vpop.xlane.xlu0 %415 }
 0x17b   : > { %v417_v20 = vmax.f32 %v413_v18, %v416_v19 }
 0x17d   : > { %v418_v21 = vsub.f32 %v413_v18, %v417_v20  ;;  %494 = vst.msk [vmem:[#allocation2] sm:$0xff] %vm353_vm2, %v417_v20  ;;  %423 = vperm.xlu0 %749, %v417_v20  }
 0x17f   : > { %v419_v28 = vmul.f32 1.442695, %v418_v21 }
 0x1f8   : > { %v424_v24 = vpop.permute.xlu0 %423 }
 0x1f9   : > { %v426_v25 = vsub.f32 %v408_v12, %v424_v24 }
 0x1fb   : > { %v427_v26 = vmul.f32 1.442695, %v426_v25 }
 0x1fd   : > { %751 = vpow2.f32 %v427_v26 }
 0x1fe   : > { %753 = vpow2.f32 %v419_v28 }
 0x20a   : > { %v752_v27 = vpop.eup %751 }
 0x20b   : > { %v431_v29 = vsel %vm356_vm0, %v752_v27, 0.0  ;;  %v444_v30 = vpack.c.bf16 %v752_v27, %v752_v27  ;;  %v754_v31 = vpop.eup %753 }
 0x20c   : > { %432 = vadd.xlane.f32.xlu1 %v431_v29  ;;  %v430_v33 = vmul.f32 %v754_v31, %v429_v32 }
 0x20d   : > { %686 = vmatmul.mubr.msk.bf16.vlgmr.msra.gmra.mxu1 %vm356_vm0, %v444_v30 }
 0x21d   : > { %440 = vperm.xlu1 %750, %v754_v31  }
 0x295   : > { %v433_v34 = vpop.xlane.xlu1 %432 }
 0x296   : > { %v434_v35 = vadd.f32 %v433_v34, %v430_v33 }
 0x298   : > { %436 = vst.msk [vmem:[#allocation3] sm:$0xff] %vm353_vm2, %v434_v35 }
 0x299   : > { %v441_v39 = vpop.permute.xlu1 %440 }
 0x29a   : > { %v443_v40 = vmul.f32 %v441_v39, %v437_v38 }
 0x29f   : > { %v498_v36 = vld [vmem:[#allocation3] sm:$0xff] }
 0x2a0   : > { %755 = vrcp.f32 %v498_v36 }
 0x2ad   : > { %v756_v37 = vpop.eup %755 }
 0x2ae   : > { %503 = vperm.xlu1 %750, %v756_v37  }
 0x2cd   : > { %v486_v41 = vpop.f32.mrf.mxu1 }
 0x2ce   : > { %v492_v42 = vadd.f32 %v486_v41, %v443_v40 }
 0x2cf   : > { %v687_v43 = vpop.f32.mrf.mxu1 }
 0x2d0   : > { %493 = vst.msk [vmem:[#allocation4] sm:$0xff] %vm356_vm0, %v492_v42 }
 0x2d1   : > { %v489_v44 = vpop.f32.mrf.mxu1 }
 0x2d3   : > { %v688_v45 = vpop.f32.mrf.mxu1 }
 0x2d7   : > { %v500_v46 = vld [vmem:[#allocation4] sm:$0xff] }
 0x329   : > { %v504_v47 = vpop.permute.xlu1 %503 }
 0x32a   : > { %v506_v48 = vmul.f32 %v504_v47, %v500_v46 }
 0x32c   : > { %v507_v49 = vpack.c.bf16 %v506_v48, %v506_v48 }
 0x32e   : > { %509 = vst.msk [vmem:[%s347_s30] sm:$0xf] %vm508_vm4, %v507_v49 }
 0x32f PF: > { %s13_s18 = sadd.s32 1, %s811_s18   ;;  %s963_s12 = smov %s791_s13 }
 0x330   : > { %p10_p12 = scmp.ge.s32.totalorder %s13_s18, 10   ;;  %s964_s13 = smov %s888_s25 }
 0x331   : > { %s965_s14 = smov %s803_s16  ;;  %s966_s15 = smov %s807_s17 }
 0x332   : > { %s967_s16 = smov %s970_s19  ;;  %s968_s17 = smov %s974_s20 }
 0x333   :  { %12 = sbr.rel (!%p10_p12) target bundleno = 4 (0x4), region = 123 }

// kernel: gemma_modular_forward.43
= control target key start
LH: loop header
LB: loop body
LE: loop exit
PB: predicated region body
PF: predicated region fallthrough
CT: control target
= control target key end

     0   :  { %vm17_vm0 = vcmask 261120   ;;  %v35_v11 = vlaneseq  ;;  %vm51_vm1 = vcmask 257024   ;;  %s97_s0 = inlined_call_operand.vmem [shape: bf16[16,32], index: 0, kind: input, shape index: {}]   ;;  %s98_s1 = inlined_call_operand.vmem [shape: bf16[1,32], index: 1, kind: input, shape index: {}]   ;;  %s99_s2 = inlined_call_operand.vmem [shape: bf16[16,32], index: 2, kind: output, shape index: {}]  }
   0x1   :  { %v63_v0 = vld [vmem:[%s97_s0] sm:$0xff]  }
   0x2   :  { %v64_v1 = vunpack.c.l.bf16 %v63_v0  ;;  %v65_v2 = vunpack.c.h.bf16 %v63_v0  ;;  %v36_v14 = vshrl.u32 %v35_v11, 7  ;;  %v33_v15 = vld [vmem:[%s98_s1] sm:$0x1] }
   0x3   :  { %v34_v16 = vunpack.c.l.bf16 %v33_v15 }
   0x4   :  { %v15_v3 = vmul.f32 %v64_v1, %v64_v1  ;;  %v16_v4 = vmul.f32 %v65_v2, %v65_v2  ;;  %v37_v17 = vsub.s32 0, %v36_v14 }
   0x6   :  { %v18_v5 = vsel %vm17_vm0, %v15_v3, 0.0  ;;  %v21_v6 = vsel %vm17_vm0, %v16_v4, 0.0  ;;  %v38_v18 = vrot.slane %v34_v16, %v37_v17 }
   0x7   :  { %19 = vadd.xlane.f32.xlu0 %v18_v5 }
   0xb   :  { %22 = vadd.xlane.f32.xlu0 %v21_v6 }
  0x90   :  { %v20_v7 = vpop.xlane.xlu0 %19 }
  0x91   :  { %v25_v8 = vmul.f32 0.03125, %v20_v7 }
  0x93   :  { %v27_v9 = vadd.f32 1e-06, %v25_v8 }
  0x94   :  { %v23_v10 = vpop.xlane.xlu0 %22 }
  0x95   :  { %66 = vrsqrt.f32 %v27_v9  ;;  %v26_v12 = vmul.f32 0.03125, %v23_v10 }
  0x97   :  { %v28_v13 = vadd.f32 1e-06, %v26_v12 }
  0x99   :  { %68 = vrsqrt.f32 %v28_v13 }
  0xa2   :  { %v67_v19 = vpop.eup %66 }
  0xa3   :  { %v31_v20 = vmul.f32 %v67_v19, %v64_v1 }
  0xa5   :  { %v39_v21 = vmul.f32 %v38_v18, %v31_v20 }
  0xa6   :  { %v69_v22 = vpop.eup %68 }
  0xa7   :  { %v41_v23 = vadd.f32 %v64_v1, %v39_v21  ;;  %v32_v24 = vmul.f32 %v69_v22, %v65_v2 }
  0xa9   :  { %v60_v25 = vpack.c.bf16 %v41_v23, %v41_v23  ;;  %v40_v26 = vmul.f32 %v38_v18, %v32_v24 }
  0xab   :  { %52 = vst.msk [vmem:[%s99_s2] sm:$0xf] %vm51_vm1, %v60_v25  ;;  %v42_v27 = vadd.f32 %v65_v2, %v40_v26 }
  0xad   :  { %v61_v28 = vpack.c.bf16 %v42_v27, %v42_v27 }
  0xaf   :  { %53 = vst.msk [vmem:[%s99_s2 + $0x4] sm:$0xf] %vm51_vm1, %v61_v28 }

// kernel: gemma_modular_forward.42
= control target key start
LH: loop header
LB: loop body
LE: loop exit
PB: predicated region body
PF: predicated region fallthrough
CT: control target
= control target key end

     0   :  { %v228_v0 = vmov 0.0   ;;  %vm229_vm0 = vmmov 0   ;;  %vm47_vm1 = vcmask 261120   ;;  %v26_v6 = vlaneseq  ;;  %s279_s1 = inlined_call_operand.vmem [shape: bf16[32,32], index: 1, kind: input, shape index: {}]   ;;  %s280_s3 = inlined_call_operand.vmem [shape: bf16[32,32], index: 3, kind: input, shape index: {}]   ;;  %s281_s0 = inlined_call_operand.vmem [shape: bf16[16,32], index: 0, kind: input, shape index: {}]   ;;  %s282_s2 = inlined_call_operand.vmem [shape: bf16[1,32], index: 2, kind: input, shape index: {}]   ;;  %s283_s4 = inlined_call_operand.vmem [shape: bf16[16,32], index: 4, kind: output, shape index: {}]  }
   0x1   :  { %197 = vmatprep.subr.bf16.mxu0 %v228_v0  ;;  %v215_v1 = vld [vmem:[%s279_s1 + $0x8] sm:$0xff]   ;;  %201 = vmatprep.mubr.msk.bf16.mxu0 %vm229_vm0, %v228_v0  ;;  %v216_v2 = vld [vmem:[%s279_s1] sm:$0xff]   ;;  %vm171_vm2 = vcmask 257024  }
   0x2   :  { %205 = vmatprep.subr.bf16.mxu1 %v228_v0  ;;  %209 = vmatprep.mubr.msk.bf16.mxu1 %vm229_vm0, %v228_v0  ;;  %v218_v3 = vld [vmem:[%s280_s3 + $0x8] sm:$0xff]   ;;  %v217_v4 = vld [vmem:[%s281_s0] sm:$0xff]   ;;  %v27_v7 = vshrl.u32 %v26_v6, 7 }
   0x3   :  { %198 = vmatpush3.bf16.msra.mxu0 %v215_v1  ;;  %206 = vmatpush3.bf16.msra.mxu1 %v218_v3  ;;  %v219_v5 = vld [vmem:[%s280_s3] sm:$0xff]  }
   0x4   :  { %199 = vmatprep.subr.bf16.mxu0 %v228_v0  ;;  %207 = vmatprep.subr.bf16.mxu1 %v228_v0  ;;  %v24_v8 = vld [vmem:[%s282_s2] sm:$0x1]  ;;  %v28_v10 = vsub.s32 0, %v27_v7 }
   0x5   :  { %v25_v9 = vunpack.c.l.bf16 %v24_v8 }
   0x7   :  { %200 = vmatpush3.bf16.msra.mxu0 %v216_v2  ;;  %208 = vmatpush3.bf16.msra.mxu1 %v219_v5  ;;  %v29_v11 = vrot.slane %v25_v9, %v28_v10 }
   0xa   :  { %202 = vmatmul.mubr.msk.bf16.vlgmr.msra.gmra.mxu0 %vm47_vm1, %v217_v4  ;;  %210 = vmatmul.mubr.msk.bf16.vlgmr.msra.gmra.mxu1 %vm47_vm1, %v217_v4 }
  0xca   :  { %v85_v12 = vpop.f32.mrf.mxu0  ;;  %v142_v16 = vpop.f32.mrf.mxu1 }
  0xcb   :  { %v86_v13 = vadd.f32 %v85_v12, %v29_v11 }
  0xcc   :  { %v203_v14 = vpop.f32.mrf.mxu0  ;;  %v211_v19 = vpop.f32.mrf.mxu1 }
  0xcd   :  { %v185_v15 = vmul.f32 -1.442695, %v86_v13 }
  0xce   :  { %v88_v17 = vpop.f32.mrf.mxu0  ;;  %v145_v22 = vpop.f32.mrf.mxu1 }
  0xcf   :  { %220 = vpow2.f32 %v185_v15  ;;  %v89_v18 = vadd.f32 %v88_v17, %v29_v11 }
  0xd0   :  { %v204_v20 = vpop.f32.mrf.mxu0  ;;  %v212_v23 = vpop.f32.mrf.mxu1 }
  0xd1   :  { %v186_v21 = vmul.f32 -1.442695, %v89_v18 }
  0xd3   :  { %222 = vpow2.f32 %v186_v21 }
  0xdc   :  { %v221_v24 = vpop.eup %220 }
  0xdd   :  { %v155_v25 = vadd.f32 1.0, %v221_v24 }
  0xdf   :  { %224 = vrcp.f32 %v155_v25 }
  0xe0   :  { %v223_v26 = vpop.eup %222 }
  0xe1   :  { %v156_v27 = vadd.f32 1.0, %v223_v26 }
  0xe3   :  { %226 = vrcp.f32 %v156_v27 }
  0xec   :  { %v225_v28 = vpop.eup %224 }
  0xed   :  { %v161_v29 = vmul.f32 %v225_v28, %v142_v16 }
  0xef   :  { %v189_v30 = vpack.c.bf16 %v161_v29, %v161_v29 }
  0xf0   :  { %v227_v31 = vpop.eup %226 }
  0xf1   :  { %172 = vst.msk [vmem:[%s283_s4] sm:$0xf] %vm171_vm2, %v189_v30  ;;  %v162_v32 = vmul.f32 %v227_v31, %v145_v22 }
  0xf3   :  { %v190_v33 = vpack.c.bf16 %v162_v32, %v162_v32 }
  0xf5   :  { %173 = vst.msk [vmem:[%s283_s4 + $0x4] sm:$0xf] %vm171_vm2, %v190_v33 }

// kernel: gemma_modular_forward.45
= control target key start
LH: loop header
LB: loop body
LE: loop exit
PB: predicated region body
PF: predicated region fallthrough
CT: control target
= control target key end

     0   :  { %s230_s0 = inlined_call_operand.vmem [shape: bf16[16,32], index: 0, kind: input, shape index: {}]   ;;  %s231_s1 = inlined_call_operand.vmem [shape: bf16[1,32], index: 1, kind: input, shape index: {}]   ;;  %s232_s2 = inlined_call_operand.vmem [shape: bf16[32,256], index: 2, kind: input, shape index: {}]   ;;  %s233_s3 = inlined_call_operand.hbm [shape: f32[16,256], index: 3, kind: output, shape index: {}]  }
   0x1   :  { %v143_v0 = vld [vmem:[%s230_s0] sm:$0xff]  }
   0x2   :  { %v144_v1 = vunpack.c.l.bf16 %v143_v0  ;;  %v145_v2 = vunpack.c.h.bf16 %v143_v0 }
   0x3   :  { %8 = vsyncpa [#allocation3], 0  ;;  %vm22_vm0 = vcmask 261120   ;;  %v150_v7 = vld [vmem:[%s232_s2 + $0x14] ss:$8 sps:$4 sm:$0xff]   ;;  %v182_v10 = vmov 0   ;;  %v40_v18 = vlaneseq }
   0x4   :  { %v20_v3 = vmul.f32 %v144_v1, %v144_v1  ;;  %v21_v4 = vmul.f32 %v145_v2, %v145_v2  ;;  %v152_v8 = vld [vmem:[%s232_s2 + $0x10] ss:$8 sps:$4 sm:$0xff]   ;;  %v153_v9 = vld [vmem:[%s232_s2 + $0x4] ss:$8 sps:$4 sm:$0xff]   ;;  %86 = vmatprep.subr.bf16.mxu0 %v150_v7  ;;  %106 = vmatprep.mubr.bf16.mxu0 %v182_v10  ;;  %v155_v11 = vld [vmem:[%s232_s2] ss:$8 sps:$4 sm:$0xff]  }
   0x5   :  { %87 = vmatpush1.bf16.msra.mxu0 %v152_v8  ;;  %v41_v19 = vshrl.u32 %v40_v18, 7  ;;  %v38_v20 = vld [vmem:[%s231_s1] sm:$0x1]  ;;  %s183_s2 = smov [#allocation2]  }
   0x6   :  { %v23_v5 = vsel %vm22_vm0, %v20_v3, 0.0  ;;  %v26_v6 = vsel %vm22_vm0, %v21_v4, 0.0  ;;  %88 = vmatprep.subr.bf16.mxu0 %v153_v9  ;;  %v39_v21 = vunpack.c.l.bf16 %v38_v20  ;;  %s126_s23 = sshll.u32 %s183_s2, 4  ;;  %s127_s23 = int_to_ptr.vmem [resolvable:$true] %s126_s23 }
   0x7   :  { %24 = vadd.xlane.f32.xlu0 %v23_v5  ;;  %v42_v22 = vsub.s32 0, %v41_v19  ;;  %s160_s1 = scalar_lea.vmem %s127_s23, 512  ;;  %p165_p1 = scmp.lt.s32.totalorder %s127_s23, %s127_s23 }
   0x8   :  { %p161_p0 = scmp.ne.s32.totalorder %s127_s23, %s160_s1  ;;  %p166_p2 = scmp.lt.s32.totalorder %s160_s1, %s160_s1 }
   0x9   :  { %89 = vmatpush1.bf16.msra.mxu0 %v155_v11  ;;  %v43_v25 = vrot.slane %v39_v21, %v42_v22 }
   0xa   :  { %p167_p3 = por %p166_p2, %p165_p1 }
   0xb   :  { %27 = vadd.xlane.f32.xlu0 %v26_v6 }
   0xc   :  { %p168_p4 = pnand %p167_p3, %p161_p0 }
  0x90   :  { %v25_v12 = vpop.xlane.xlu0 %24 }
  0x91   :  { %v30_v13 = vmul.f32 0.03125, %v25_v12 }
  0x93   :  { %v32_v14 = vadd.f32 1e-06, %v30_v13 }
  0x94   :  { %v28_v15 = vpop.xlane.xlu0 %27 }
  0x95   :  { %156 = vrsqrt.f32 %v32_v14  ;;  %v31_v16 = vmul.f32 0.03125, %v28_v15 }
  0x97   :  { %v33_v17 = vadd.f32 1e-06, %v31_v16 }
  0x99   :  { %158 = vrsqrt.f32 %v33_v17 }
  0xa2   :  { %v157_v23 = vpop.eup %156 }
  0xa3   :  { %v36_v24 = vmul.f32 %v157_v23, %v144_v1 }
  0xa5   :  { %v44_v28 = vmul.f32 %v43_v25, %v36_v24 }
  0xa6   :  { %v159_v26 = vpop.eup %158 }
  0xa7   :  { %v37_v27 = vmul.f32 %v159_v26, %v145_v2 }
  0xa9   :  { %v45_v29 = vmul.f32 %v43_v25, %v37_v27 }
  0xab   :  { %v46_v30 = vpack.c.bf16 %v45_v29, %v44_v28 }
  0xad   :  { %141 = vmatmul.mubr.msk.bf16.vlgmr.msra.gmra.mxu0 %vm22_vm0, %v46_v30 }
 0x16d   :  { %v108_v31 = vpop.f32.mrf.mxu0 }
 0x16e   :  { %117 = vst [vmem:[#allocation2] sm:$0xff] %v108_v31 }
 0x16f   :  { %v110_v32 = vpop.f32.mrf.mxu0 }
 0x170   :  { %118 = vst [vmem:[#allocation2 + $0x8] sm:$0xff] %v110_v32 }
 0x171   :  { %v112_v33 = vpop.f32.mrf.mxu0 }
 0x172   :  { %119 = vst [vmem:[#allocation2 + $0x10] sm:$0xff] %v112_v33 }
 0x173   :  { %v114_v34 = vpop.f32.mrf.mxu0 }
 0x174   :  { %120 = vst [vmem:[#allocation2 + $0x18] sm:$0xff] %v114_v34 }
 0x175   :  { %171 = shalt.err (!%p168_p4)
}
 0x176   :  { %s184_s24 = smov 256   ;;  %s185_s25 = smov 16  }
 0x177   :  { %132 = dma.vmem_to_hbm [thread:$0]  %s127_s23, 512, %s233_s3, [#allocation3], %s184_s24, %s184_s24, %s185_s25  }
 0x178   :  { %180 = dma.done.wait [#allocation3], 512  }
 0x179   :  { %181 = vsyncadd [#allocation3], 4294966784 }
 0x17a   :  { %136 = vsyncpa [#allocation3], 1 }

</bundles_post_ra>
